<compile_context>
chip_gen: v7x
topology: tpu7x:2x2x1
jax: 0.10.0
libtpu: 0.0.40
codegen_flags: <defaults>
</compile_context>

<pallas_src>
import math

import jax
import jax.numpy as jnp
from jax.experimental import pallas as pl
from jax.experimental.pallas import tpu as pltpu


# ----------------------------- Pallas kernel ------------------------------- #
def _make_kernel(n_heads, has_wout, mxu_dtype, approx_softmax):
    f32 = jnp.float32

    def kernel(*refs):
        if has_wout:
            (xq_ref, xkv_ref, wq_ref, bq_ref, wkc_ref, wvc_ref, wk_ref, bk_ref,
             wv_ref, bv_ref, kmask_ref, wout_ref, bout_ref, o_ref) = refs
        else:
            (xq_ref, xkv_ref, wq_ref, bq_ref, wkc_ref, wvc_ref, wk_ref, bk_ref,
             wv_ref, bv_ref, kmask_ref, o_ref) = refs
            wout_ref = bout_ref = None

        bb, tq, d = xq_ref.shape
        tc = wkc_ref.shape[1]              # compressed tokens (padded to mult. of 8)
        dh = d // n_heads

        # ---- Q projection (1/sqrt(d_head) pre-folded into W_q / b_q) -------
        xq2 = xq_ref[...].reshape(bb * tq, d)                            # bf16
        q2 = jnp.dot(xq2, wq_ref[...], preferred_element_type=f32) + bq_ref[...]

        # ---- token compression FIRST (Tk -> Tc), then K/V feature projections.
        # Commuting is exact because both ops are linear; the bias correction
        # rowsum(Wc)*b_proj + b_c is folded host-side into bk_ref / bv_ref.
        xkv3 = xkv_ref[...]                                              # (bb, tk, d)
        xck = jnp.einsum("bct,btd->bcd", wkc_ref[...], xkv3,
                         preferred_element_type=f32)                     # (bb, tc, d)
        xcv = jnp.einsum("bct,btd->bcd", wvc_ref[...], xkv3,
                         preferred_element_type=f32)

        kc2 = jnp.dot(xck.reshape(bb * tc, d).astype(mxu_dtype), wk_ref[...],
                      preferred_element_type=f32)
        vc2 = jnp.dot(xcv.reshape(bb * tc, d).astype(mxu_dtype), wv_ref[...],
                      preferred_element_type=f32)
        kc3 = (kc2.reshape(bb, tc, d) + bk_ref[...]).astype(mxu_dtype)   # (bb, tc, d)
        vc3 = (vc2.reshape(bb, tc, d) + bv_ref[...]).astype(mxu_dtype)

        q3 = q2.reshape(bb, tq, d).astype(mxu_dtype)                     # (bb, tq, d)
        kmask = kmask_ref[...]                                           # (1, tc) 0/-1e30

        # ---- per-head attention; head outputs kept in registers ------------
        head_outs = []
        for h in range(n_heads):               # heads are consecutive d-slices
            lo = h * dh
            qh = q3[:, :, lo:lo + dh]
            kh = kc3[:, :, lo:lo + dh]
            vh = vc3[:, :, lo:lo + dh]

            # scores: contract head dim, no explicit transpose materialized
            s = jnp.einsum("bqe,bke->bqk", qh, kh,
                           preferred_element_type=f32)                   # (bb, tq, tc)
            s = s + kmask                      # drop padded compressed keys
            s = s - jnp.max(s, axis=-1, keepdims=True)
            p = jnp.exp(s)
            denom = jnp.sum(p, axis=-1, keepdims=True)
            p = p * pl.reciprocal(denom, approx=approx_softmax)

            oh = jnp.einsum("bqk,bke->bqe", p.astype(mxu_dtype), vh,
                            preferred_element_type=f32)                  # (bb, tq, dh)
            head_outs.append(oh.reshape(bb * tq, dh))

        # head "concat" happens in registers (lane concat) and feeds a single
        # lane-dense W_out matmul: no VMEM scratch, no masked column stores.
        merged = head_outs[0] if n_heads == 1 else jnp.concatenate(head_outs, axis=-1)

        if has_wout:
            out2 = (jnp.dot(merged.astype(mxu_dtype), wout_ref[...],
                            preferred_element_type=f32) + bout_ref[...])
        else:
            out2 = merged                      # PyTorch: W_out is None if H == 1

        o_ref[...] = out2.reshape(bb, tq, d).astype(o_ref.dtype)

    return kernel


# ------------------------- generation-aware sizing -------------------------- #
def _tpu_info():
    """Return (physical VMEM bytes per TensorCore, TensorCores per chip)."""
    vmem = 64 << 20            # conservative default (v7x: 64 MiB / TensorCore)
    cores = 1
    try:
        info = pltpu.get_tpu_info()
        for attr in ("vmem_capacity_bytes", "vmem_bytes", "vmem_size_bytes"):
            v = getattr(info, attr, None)
            if v:
                vmem = int(v)
                break
        for attr in ("num_cores", "num_tensorcores", "tensorcore_count",
                     "cores_per_chip"):
            v = getattr(info, attr, None)
            if v:
                cores = int(v)
                break
    except Exception:
        pass
    return vmem, cores


def _vmem_estimate(bb, tq, tk, tc, d, has_wout):
    """Per-step VMEM footprint: double-buffered I/O blocks + resident weights
    (also double-buffered by the pipeline) + f32/bf16 intermediates."""
    io = 2 * bb * (tq + tk) * d * 2 + 2 * bb * tq * d * 4
    n_dd = 3 + (1 if has_wout else 0)                       # wq, wk, wv (+ wout)
    weights = 2 * (n_dd * d * d * 2                         # bf16 projection weights
                   + 2 * bb * tc * tk * 2                   # host-broadcast Wkc/Wvc
                   + (2 * d + 2 * tc * d + tc) * 4)         # f32 biases + mask
    inter = (bb * tq * d * (4 + 2 + 4 + 2)                  # q (f32+bf16), merged
             + 2 * bb * tc * d * (4 + 2 + 4 + 2)            # xck/xcv, kc/vc
             + 2 * bb * tq * tc * 4)                        # scores / probs (live)
    return io + weights + inter


def _choose_block_b(B, tq, tk, tc, d, has_wout, phys_vmem, n_cores):
    """Grow M (= block_b * Tq) toward ~512 rows to amortize per-step overhead and
    fill the MXU, stay under a generation-aware VMEM budget, divide B evenly, and
    keep the parallel grid a multiple of the TensorCore count (v7x megacore)."""
    budget = max(phys_vmem // 3, 8 << 20)
    bb = max(1, min(B, max(1, 512 // max(tq, 1))))
    while bb > 1 and _vmem_estimate(bb, tq, tk, tc, d, has_wout) > budget:
        bb //= 2
    while B % bb:
        bb -= 1
    if n_cores > 1 and B >= n_cores:
        while bb > 1 and (B // bb) % n_cores != 0:
            bb -= 1
            while B % bb:
                bb -= 1
    return max(bb, 1)


# --------------------------------- wrapper ---------------------------------- #
def multihead_attention(x_q, x_kv, params, n_heads, *, block_b=None,
                        mxu_dtype=jnp.bfloat16, out_dtype=None,
                        approx_softmax=True):
    B, Tq, d = x_q.shape
    Bk, Tk, _ = x_kv.shape
    assert Bk == B
    if n_heads > 1:
        assert d % n_heads == 0, "d must be divisible by n_heads"
    Tc = params["wkc"].shape[0]
    dh = d // n_heads
    has_wout = n_heads > 1
    out_dtype = x_q.dtype if out_dtype is None else out_dtype
    f32 = jnp.float32

    # Pad the compressed-token axis to a multiple of 8 (sublane count) so all
    # in-kernel reshapes are layout-preserving; padded keys are masked out.
    Tc_pad = max(8, -(-Tc // 8) * 8)

    phys_vmem, n_cores = _tpu_info()
    if block_b is None:
        block_b = _choose_block_b(B, Tq, Tk, Tc_pad, d, has_wout, phys_vmem, n_cores)
    assert B % block_b == 0
    grid = (B // block_b,)

    # --- host-side parameter packing (cheap XLA ops, once per call) ---------
    scale = 1.0 / math.sqrt(dh)
    wq_t = (params["wq_t"] * scale).astype(mxu_dtype)        # fold 1/sqrt(d_head)
    bq = (params["bq"] * scale).astype(f32)                  # (1, d)
    wk_t = params["wk_t"].astype(mxu_dtype)                  # (d, d)
    wv_t = params["wv_t"].astype(mxu_dtype)

    def pad_rows(a, rows):
        extra = rows - a.shape[0]
        return a if extra == 0 else jnp.pad(a, ((0, extra), (0, 0)))

    wkc = pad_rows(params["wkc"], Tc_pad)                    # (Tc_pad, Tk) f32
    wvc = pad_rows(params["wvc"], Tc_pad)
    bkc = pad_rows(params["bkc"], Tc_pad)                    # (Tc_pad, 1)
    bvc = pad_rows(params["bvc"], Tc_pad)

    # Commuted-compression biases: b'_k = rowsum(Wkc)*b_k + b_kc  (same for V).
    bk_c = (jnp.sum(wkc, axis=1, keepdims=True) * params["bk"] + bkc).astype(f32)
    bv_c = (jnp.sum(wvc, axis=1, keepdims=True) * params["bv"] + bvc).astype(f32)

    # Host-side batch broadcast of the compression weights: DMA'd once (constant
    # index_map), avoids a per-grid-step broadcast_in_dim inside the kernel.
    wkc_bb = jnp.broadcast_to(wkc.astype(mxu_dtype)[None], (block_b, Tc_pad, Tk))
    wvc_bb = jnp.broadcast_to(wvc.astype(mxu_dtype)[None], (block_b, Tc_pad, Tk))

    # Additive softmax mask removing the padded compressed keys.
    kmask = jnp.where(jnp.arange(Tc_pad) < Tc, 0.0, -1e30).astype(f32)[None, :]

    # bf16 activations halve the per-step DMA; accumulation stays f32 in-kernel.
    xq_b = x_q.astype(mxu_dtype)
    xkv_b = x_kv.astype(mxu_dtype)

    def resident(shape):
        nd = len(shape)
        return pl.BlockSpec(shape, lambda b, _nd=nd: (0,) * _nd)

    # NOTE: resident weights could be single-buffered (pipeline_mode) to save a
    # little VMEM; left default-buffered for portability.
    in_specs = [
        pl.BlockSpec((block_b, Tq, d), lambda b: (b, 0, 0)),   # x_q block
        pl.BlockSpec((block_b, Tk, d), lambda b: (b, 0, 0)),   # x_kv block
        resident((d, d)), resident((1, d)),                    # W_q^T (scaled), b_q
        resident((block_b, Tc_pad, Tk)),                       # Wkc (batch-broadcast)
        resident((block_b, Tc_pad, Tk)),                       # Wvc (batch-broadcast)
        resident((d, d)), resident((Tc_pad, d)),               # W_k^T, commuted b_k
        resident((d, d)), resident((Tc_pad, d)),               # W_v^T, commuted b_v
        resident((1, Tc_pad)),                                 # padded-key mask
    ]
    args = [xq_b, xkv_b, wq_t, bq, wkc_bb, wvc_bb, wk_t, bk_c, wv_t, bv_c, kmask]
    if has_wout:                                               # only ship when used
        in_specs += [resident((d, d)), resident((1, d))]
        args += [params["wout_t"].astype(mxu_dtype), params["bout"].astype(f32)]

    est = _vmem_estimate(block_b, Tq, Tk, Tc_pad, d, has_wout)
    vmem_limit = int(min(max(32 << 20, 2 * est), max(16 << 20, phys_vmem * 9 // 10)))

    kernel = _make_kernel(n_heads, has_wout, mxu_dtype, approx_softmax)
    return pl.pallas_call(
        kernel,
        out_shape=jax.ShapeDtypeStruct((B, Tq, d), out_dtype),
        grid=grid,
        in_specs=in_specs,
        out_specs=pl.BlockSpec((block_b, Tq, d), lambda b: (b, 0, 0)),
        compiler_params=pltpu.CompilerParams(
            dimension_semantics=("parallel",),
            vmem_limit_bytes=vmem_limit),
    )(*args)


# ------------------------ pure-JAX reference (check) ------------------------ #
def multihead_attention_ref(x_q, x_kv, params, n_heads):
    B, Tq, d = x_q.shape
    dh = d // n_heads
    q = x_q @ params["wq_t"] + params["bq"][0]
    k = x_kv @ params["wk_t"] + params["bk"][0]
    v = x_kv @ params["wv_t"] + params["bv"][0]
    kc = jnp.einsum("ct,btd->bcd", params["wkc"], k) + params["bkc"][None, :, :]
    vc = jnp.einsum("ct,btd->bcd", params["wvc"], v) + params["bvc"][None, :, :]

    def heads(x):
        b, t, _ = x.shape
        return x.reshape(b, t, n_heads, dh).transpose(0, 2, 1, 3)

    qh, kh, vh = heads(q), heads(kc), heads(vc)
    s = jnp.einsum("bhqe,bhke->bhqk", qh, kh) / math.sqrt(dh)
    p = jax.nn.softmax(s, axis=-1)
    o = jnp.einsum("bhqk,bhke->bhqe", p, vh)
    o = o.transpose(0, 2, 1, 3).reshape(B, Tq, d)
    if n_heads > 1:                       # PyTorch: W_out is None when n_heads == 1
        o = o @ params["wout_t"] + params["bout"][0]
    return o


# ---------------------------- parameter creation ---------------------------- #
def init_params(key, d, n_heads, n_tokens_kv, n_compressed):
    ks = jax.random.split(key, 8)

    def xavier(k, fan_in, fan_out, gain):
        bound = gain * math.sqrt(6.0 / (fan_in + fan_out))
        return jax.random.uniform(k, (fan_out, fan_in), jnp.float32, -bound, bound)

    def torch_default_w(k, fan_in, fan_out):
        bound = 1.0 / math.sqrt(fan_in)
        return jax.random.uniform(k, (fan_out, fan_in), jnp.float32, -bound, bound)

    def torch_default_b(k, fan_in, fan_out):
        bound = 1.0 / math.sqrt(fan_in)
        return jax.random.uniform(k, (fan_out,), jnp.float32, -bound, bound)

    gain = 1.0 / math.sqrt(2.0)
    wq = xavier(ks[0], d, d, gain)                 # xavier_uniform_, gain 1/sqrt(2)
    wk = xavier(ks[1], d, d, gain)
    wv = xavier(ks[2], d, d, gain) if n_heads > 1 else torch_default_w(ks[2], d, d)
    wout = torch_default_w(ks[3], d, d)            # nn.Linear default init, bias zeroed
    wkc = torch_default_w(ks[4], n_tokens_kv, n_compressed)
    bkc = torch_default_b(ks[5], n_tokens_kv, n_compressed)
    wvc = torch_default_w(ks[6], n_tokens_kv, n_compressed)
    bvc = torch_default_b(ks[7], n_tokens_kv, n_compressed)

    zeros_d = jnp.zeros((1, d), jnp.float32)
    return {
        "wq_t": wq.T, "bq": zeros_d,               # zeros_(bias)
        "wk_t": wk.T, "bk": zeros_d,
        "wv_t": wv.T, "bv": zeros_d,
        "wkc": wkc, "bkc": bkc[:, None],           # Linear(Tk -> Tc): (Tc, Tk), (Tc, 1)
        "wvc": wvc, "bvc": bvc[:, None],
        "wout_t": wout.T, "bout": zeros_d,         # zeros_(W_out.bias)
    }


# ------------------------------------ main ----------------------------------- #
if __name__ == "__main__":
    B, Tq, Tk, Tc, d, H = 2, 8, 8, 4, 32, 4        # d % n_heads == 0

    key = jax.random.PRNGKey(0)
    k_xq, k_xkv, k_p = jax.random.split(key, 3)
    x_q = jax.random.normal(k_xq, (B, Tq, d), jnp.float32)
    x_kv = jax.random.normal(k_xkv, (B, Tk, d), jnp.float32)
    params = init_params(k_p, d, H, Tk, Tc)

    out = jax.block_until_ready(multihead_attention(x_q, x_kv, params, H))
    ref = multihead_attention_ref(x_q, x_kv, params, H)

    assert out.shape == (B, Tq, d)
    max_err = float(jnp.max(jnp.abs(out - ref)))
    # bf16 MXU operands + approximate softmax reciprocal vs. f32 reference.
    assert jnp.allclose(out, ref, rtol=5e-2, atol=5e-2), max_err
    print("KERNEL_OK")
</pallas_src>

<mosaic_0001>
module attributes {stable_mosaic.version = 11 : i64} {
  func.func @kernel(%arg0: i32, %arg1: memref<2x8x32xbf16, #tpu.memory_space<vmem>>, %arg2: memref<2x8x32xbf16, #tpu.memory_space<vmem>>, %arg3: memref<32x32xbf16, #tpu.memory_space<vmem>>, %arg4: memref<1x32xf32, #tpu.memory_space<vmem>>, %arg5: memref<2x8x8xbf16, #tpu.memory_space<vmem>>, %arg6: memref<2x8x8xbf16, #tpu.memory_space<vmem>>, %arg7: memref<32x32xbf16, #tpu.memory_space<vmem>>, %arg8: memref<8x32xf32, #tpu.memory_space<vmem>>, %arg9: memref<32x32xbf16, #tpu.memory_space<vmem>>, %arg10: memref<8x32xf32, #tpu.memory_space<vmem>>, %arg11: memref<1x8xf32, #tpu.memory_space<vmem>>, %arg12: memref<32x32xbf16, #tpu.memory_space<vmem>>, %arg13: memref<1x32xf32, #tpu.memory_space<vmem>>, %arg14: memref<2x8x32xf32, #tpu.memory_space<vmem>>) attributes {dimension_semantics = [#tpu.dimension_semantics<parallel>], iteration_bounds = array<i64: 1>, scalar_prefetch = 0 : i64, scratch_operands = 0 : i64, tpu.core_type = #tpu.core_type<tc>, window_params = [{transform_indices = @transform_0, window_bounds = array<i64: 2, 8, 32>}, {transform_indices = @transform_1, window_bounds = array<i64: 2, 8, 32>}, {pipeline_mode = #tpu.pipeline_mode<synchronous>, transform_indices = @transform_2, window_bounds = array<i64: 32, 32>}, {pipeline_mode = #tpu.pipeline_mode<synchronous>, transform_indices = @transform_3, window_bounds = array<i64: 1, 32>}, {pipeline_mode = #tpu.pipeline_mode<synchronous>, transform_indices = @transform_4, window_bounds = array<i64: 2, 8, 8>}, {pipeline_mode = #tpu.pipeline_mode<synchronous>, transform_indices = @transform_5, window_bounds = array<i64: 2, 8, 8>}, {pipeline_mode = #tpu.pipeline_mode<synchronous>, transform_indices = @transform_6, window_bounds = array<i64: 32, 32>}, {pipeline_mode = #tpu.pipeline_mode<synchronous>, transform_indices = @transform_7, window_bounds = array<i64: 8, 32>}, {pipeline_mode = #tpu.pipeline_mode<synchronous>, transform_indices = @transform_8, window_bounds = array<i64: 32, 32>}, {pipeline_mode = #tpu.pipeline_mode<synchronous>, transform_indices = @transform_9, window_bounds = array<i64: 8, 32>}, {pipeline_mode = #tpu.pipeline_mode<synchronous>, transform_indices = @transform_10, window_bounds = array<i64: 1, 8>}, {pipeline_mode = #tpu.pipeline_mode<synchronous>, transform_indices = @transform_11, window_bounds = array<i64: 32, 32>}, {pipeline_mode = #tpu.pipeline_mode<synchronous>, transform_indices = @transform_12, window_bounds = array<i64: 1, 32>}, {transform_indices = @transform_13, window_bounds = array<i64: 2, 8, 32>}]} {
    %c0 = arith.constant 0 : index
    %c0_0 = arith.constant 0 : index
    %c0_1 = arith.constant 0 : index
    %0 = vector.load %arg1[%c0, %c0_0, %c0_1] : memref<2x8x32xbf16, #tpu.memory_space<vmem>>, vector<2x8x32xbf16>
    %1 = vector.shape_cast %0 : vector<2x8x32xbf16> to vector<16x32xbf16>
    %c0_2 = arith.constant 0 : index
    %c0_3 = arith.constant 0 : index
    %2 = vector.load %arg3[%c0_2, %c0_3] : memref<32x32xbf16, #tpu.memory_space<vmem>>, vector<32x32xbf16>
    %cst = arith.constant dense<0.000000e+00> : vector<16x32xf32>
    %3 = tpu.matmul %1, %2, %cst {dimension_numbers = #tpu.dot_dimension_numbers<[1], [0], [0], [1], [0, 0, 1, 1], [], []>} : vector<16x32xbf16>, vector<32x32xbf16>, vector<16x32xf32> -> vector<16x32xf32>
    %c0_4 = arith.constant 0 : index
    %c0_5 = arith.constant 0 : index
    %4 = vector.load %arg4[%c0_4, %c0_5] : memref<1x32xf32, #tpu.memory_space<vmem>>, vector<1x32xf32>
    %5 = vector.broadcast %4 : vector<1x32xf32> to vector<16x32xf32>
    %6 = arith.addf %3, %5 : vector<16x32xf32>
    %c0_6 = arith.constant 0 : index
    %c0_7 = arith.constant 0 : index
    %c0_8 = arith.constant 0 : index
    %7 = vector.load %arg2[%c0_6, %c0_7, %c0_8] : memref<2x8x32xbf16, #tpu.memory_space<vmem>>, vector<2x8x32xbf16>
    %c0_9 = arith.constant 0 : index
    %c0_10 = arith.constant 0 : index
    %c0_11 = arith.constant 0 : index
    %8 = vector.load %arg5[%c0_9, %c0_10, %c0_11] : memref<2x8x8xbf16, #tpu.memory_space<vmem>>, vector<2x8x8xbf16>
    "tpu.trace_start"() <{level = 10 : i32, message = "bct,btd->bcd"}> : () -> ()
    %cst_12 = arith.constant dense<0.000000e+00> : vector<2x8x32xf32>
    %9 = tpu.matmul %8, %7, %cst_12 {dimension_numbers = #tpu.dot_dimension_numbers<[2], [1], [1], [2], [0, 0, 0, 1, 1, 2], [0], [0]>} : vector<2x8x8xbf16>, vector<2x8x32xbf16>, vector<2x8x32xf32> -> vector<2x8x32xf32>
    "tpu.trace_stop"() : () -> ()
    %c0_13 = arith.constant 0 : index
    %c0_14 = arith.constant 0 : index
    %c0_15 = arith.constant 0 : index
    %10 = vector.load %arg6[%c0_13, %c0_14, %c0_15] : memref<2x8x8xbf16, #tpu.memory_space<vmem>>, vector<2x8x8xbf16>
    "tpu.trace_start"() <{level = 10 : i32, message = "bct,btd->bcd"}> : () -> ()
    %cst_16 = arith.constant dense<0.000000e+00> : vector<2x8x32xf32>
    %11 = tpu.matmul %10, %7, %cst_16 {dimension_numbers = #tpu.dot_dimension_numbers<[2], [1], [1], [2], [0, 0, 0, 1, 1, 2], [0], [0]>} : vector<2x8x8xbf16>, vector<2x8x32xbf16>, vector<2x8x32xf32> -> vector<2x8x32xf32>
    "tpu.trace_stop"() : () -> ()
    %12 = vector.shape_cast %9 : vector<2x8x32xf32> to vector<16x32xf32>
    %13 = arith.truncf %12 : vector<16x32xf32> to vector<16x32xbf16>
    %c0_17 = arith.constant 0 : index
    %c0_18 = arith.constant 0 : index
    %14 = vector.load %arg7[%c0_17, %c0_18] : memref<32x32xbf16, #tpu.memory_space<vmem>>, vector<32x32xbf16>
    %cst_19 = arith.constant dense<0.000000e+00> : vector<16x32xf32>
    %15 = tpu.matmul %13, %14, %cst_19 {dimension_numbers = #tpu.dot_dimension_numbers<[1], [0], [0], [1], [0, 0, 1, 1], [], []>} : vector<16x32xbf16>, vector<32x32xbf16>, vector<16x32xf32> -> vector<16x32xf32>
    %16 = vector.shape_cast %11 : vector<2x8x32xf32> to vector<16x32xf32>
    %17 = arith.truncf %16 : vector<16x32xf32> to vector<16x32xbf16>
    %c0_20 = arith.constant 0 : index
    %c0_21 = arith.constant 0 : index
    %18 = vector.load %arg9[%c0_20, %c0_21] : memref<32x32xbf16, #tpu.memory_space<vmem>>, vector<32x32xbf16>
    %cst_22 = arith.constant dense<0.000000e+00> : vector<16x32xf32>
    %19 = tpu.matmul %17, %18, %cst_22 {dimension_numbers = #tpu.dot_dimension_numbers<[1], [0], [0], [1], [0, 0, 1, 1], [], []>} : vector<16x32xbf16>, vector<32x32xbf16>, vector<16x32xf32> -> vector<16x32xf32>
    %20 = vector.shape_cast %15 : vector<16x32xf32> to vector<2x8x32xf32>
    %c0_23 = arith.constant 0 : index
    %c0_24 = arith.constant 0 : index
    %21 = vector.load %arg8[%c0_23, %c0_24] : memref<8x32xf32, #tpu.memory_space<vmem>>, vector<8x32xf32>
    %22 = vector.shape_cast %21 : vector<8x32xf32> to vector<1x8x32xf32>
    %23 = vector.broadcast %22 : vector<1x8x32xf32> to vector<2x8x32xf32>
    %24 = arith.addf %20, %23 : vector<2x8x32xf32>
    %25 = arith.truncf %24 : vector<2x8x32xf32> to vector<2x8x32xbf16>
    %26 = vector.shape_cast %19 : vector<16x32xf32> to vector<2x8x32xf32>
    %c0_25 = arith.constant 0 : index
    %c0_26 = arith.constant 0 : index
    %27 = vector.load %arg10[%c0_25, %c0_26] : memref<8x32xf32, #tpu.memory_space<vmem>>, vector<8x32xf32>
    %28 = vector.shape_cast %27 : vector<8x32xf32> to vector<1x8x32xf32>
    %29 = vector.broadcast %28 : vector<1x8x32xf32> to vector<2x8x32xf32>
    %30 = arith.addf %26, %29 : vector<2x8x32xf32>
    %31 = arith.truncf %30 : vector<2x8x32xf32> to vector<2x8x32xbf16>
    %32 = vector.shape_cast %6 : vector<16x32xf32> to vector<2x8x32xf32>
    %33 = arith.truncf %32 : vector<2x8x32xf32> to vector<2x8x32xbf16>
    %c0_27 = arith.constant 0 : index
    %c0_28 = arith.constant 0 : index
    %34 = vector.load %arg11[%c0_27, %c0_28] : memref<1x8xf32, #tpu.memory_space<vmem>>, vector<1x8xf32>
    %35 = vector.extract_strided_slice %33 {offsets = [0, 0, 0], sizes = [2, 8, 8], strides = [1, 1, 1]} : vector<2x8x32xbf16> to vector<2x8x8xbf16>
    %36 = vector.extract_strided_slice %25 {offsets = [0, 0, 0], sizes = [2, 8, 8], strides = [1, 1, 1]} : vector<2x8x32xbf16> to vector<2x8x8xbf16>
    %37 = vector.extract_strided_slice %31 {offsets = [0, 0, 0], sizes = [2, 8, 8], strides = [1, 1, 1]} : vector<2x8x32xbf16> to vector<2x8x8xbf16>
    "tpu.trace_start"() <{level = 10 : i32, message = "bqe,bke->bqk"}> : () -> ()
    %cst_29 = arith.constant dense<0.000000e+00> : vector<2x8x8xf32>
    %38 = tpu.matmul %35, %36, %cst_29 {dimension_numbers = #tpu.dot_dimension_numbers<[2], [2], [1], [1], [0, 0, 0, 1, 1, 1], [0], [0]>} : vector<2x8x8xbf16>, vector<2x8x8xbf16>, vector<2x8x8xf32> -> vector<2x8x8xf32>
    "tpu.trace_stop"() : () -> ()
    %39 = vector.shape_cast %34 : vector<1x8xf32> to vector<1x1x8xf32>
    %40 = vector.broadcast %39 : vector<1x1x8xf32> to vector<2x8x8xf32>
    %41 = arith.addf %38, %40 : vector<2x8x8xf32>
    %cst_30 = arith.constant dense<0xFF800000> : vector<2x8xf32>
    %42 = vector.multi_reduction <maximumf>, %41, %cst_30 [2] : vector<2x8x8xf32> to vector<2x8xf32>
    %43 = vector.shape_cast %42 : vector<2x8xf32> to vector<2x8x1xf32>
    %44 = vector.broadcast %43 : vector<2x8x1xf32> to vector<2x8x8xf32>
    %45 = arith.subf %41, %44 : vector<2x8x8xf32>
    %46 = math.exp %45 : vector<2x8x8xf32>
    %cst_31 = arith.constant dense<0.000000e+00> : vector<2x8xf32>
    %47 = vector.multi_reduction <add>, %46, %cst_31 [2] : vector<2x8x8xf32> to vector<2x8xf32>
    %48 = vector.shape_cast %47 : vector<2x8xf32> to vector<2x8x1xf32>
    %49 = tpu.reciprocal %48 {approx = true} : vector<2x8x1xf32> -> vector<2x8x1xf32>
    %50 = vector.broadcast %49 : vector<2x8x1xf32> to vector<2x8x8xf32>
    %51 = arith.mulf %46, %50 : vector<2x8x8xf32>
    %52 = arith.truncf %51 : vector<2x8x8xf32> to vector<2x8x8xbf16>
    "tpu.trace_start"() <{level = 10 : i32, message = "bqk,bke->bqe"}> : () -> ()
    %cst_32 = arith.constant dense<0.000000e+00> : vector<2x8x8xf32>
    %53 = tpu.matmul %52, %37, %cst_32 {dimension_numbers = #tpu.dot_dimension_numbers<[2], [1], [1], [2], [0, 0, 0, 1, 1, 2], [0], [0]>} : vector<2x8x8xbf16>, vector<2x8x8xbf16>, vector<2x8x8xf32> -> vector<2x8x8xf32>
    "tpu.trace_stop"() : () -> ()
    %54 = vector.shape_cast %53 : vector<2x8x8xf32> to vector<16x8xf32>
    %55 = vector.extract_strided_slice %33 {offsets = [0, 0, 8], sizes = [2, 8, 8], strides = [1, 1, 1]} : vector<2x8x32xbf16> to vector<2x8x8xbf16>
    %56 = vector.extract_strided_slice %25 {offsets = [0, 0, 8], sizes = [2, 8, 8], strides = [1, 1, 1]} : vector<2x8x32xbf16> to vector<2x8x8xbf16>
    %57 = vector.extract_strided_slice %31 {offsets = [0, 0, 8], sizes = [2, 8, 8], strides = [1, 1, 1]} : vector<2x8x32xbf16> to vector<2x8x8xbf16>
    "tpu.trace_start"() <{level = 10 : i32, message = "bqe,bke->bqk"}> : () -> ()
    %cst_33 = arith.constant dense<0.000000e+00> : vector<2x8x8xf32>
    %58 = tpu.matmul %55, %56, %cst_33 {dimension_numbers = #tpu.dot_dimension_numbers<[2], [2], [1], [1], [0, 0, 0, 1, 1, 1], [0], [0]>} : vector<2x8x8xbf16>, vector<2x8x8xbf16>, vector<2x8x8xf32> -> vector<2x8x8xf32>
    "tpu.trace_stop"() : () -> ()
    %59 = vector.shape_cast %34 : vector<1x8xf32> to vector<1x1x8xf32>
    %60 = vector.broadcast %59 : vector<1x1x8xf32> to vector<2x8x8xf32>
    %61 = arith.addf %58, %60 : vector<2x8x8xf32>
    %cst_34 = arith.constant dense<0xFF800000> : vector<2x8xf32>
    %62 = vector.multi_reduction <maximumf>, %61, %cst_34 [2] : vector<2x8x8xf32> to vector<2x8xf32>
    %63 = vector.shape_cast %62 : vector<2x8xf32> to vector<2x8x1xf32>
    %64 = vector.broadcast %63 : vector<2x8x1xf32> to vector<2x8x8xf32>
    %65 = arith.subf %61, %64 : vector<2x8x8xf32>
    %66 = math.exp %65 : vector<2x8x8xf32>
    %cst_35 = arith.constant dense<0.000000e+00> : vector<2x8xf32>
    %67 = vector.multi_reduction <add>, %66, %cst_35 [2] : vector<2x8x8xf32> to vector<2x8xf32>
    %68 = vector.shape_cast %67 : vector<2x8xf32> to vector<2x8x1xf32>
    %69 = tpu.reciprocal %68 {approx = true} : vector<2x8x1xf32> -> vector<2x8x1xf32>
    %70 = vector.broadcast %69 : vector<2x8x1xf32> to vector<2x8x8xf32>
    %71 = arith.mulf %66, %70 : vector<2x8x8xf32>
    %72 = arith.truncf %71 : vector<2x8x8xf32> to vector<2x8x8xbf16>
    "tpu.trace_start"() <{level = 10 : i32, message = "bqk,bke->bqe"}> : () -> ()
    %cst_36 = arith.constant dense<0.000000e+00> : vector<2x8x8xf32>
    %73 = tpu.matmul %72, %57, %cst_36 {dimension_numbers = #tpu.dot_dimension_numbers<[2], [1], [1], [2], [0, 0, 0, 1, 1, 2], [0], [0]>} : vector<2x8x8xbf16>, vector<2x8x8xbf16>, vector<2x8x8xf32> -> vector<2x8x8xf32>
    "tpu.trace_stop"() : () -> ()
    %74 = vector.shape_cast %73 : vector<2x8x8xf32> to vector<16x8xf32>
    %75 = vector.extract_strided_slice %33 {offsets = [0, 0, 16], sizes = [2, 8, 8], strides = [1, 1, 1]} : vector<2x8x32xbf16> to vector<2x8x8xbf16>
    %76 = vector.extract_strided_slice %25 {offsets = [0, 0, 16], sizes = [2, 8, 8], strides = [1, 1, 1]} : vector<2x8x32xbf16> to vector<2x8x8xbf16>
    %77 = vector.extract_strided_slice %31 {offsets = [0, 0, 16], sizes = [2, 8, 8], strides = [1, 1, 1]} : vector<2x8x32xbf16> to vector<2x8x8xbf16>
    "tpu.trace_start"() <{level = 10 : i32, message = "bqe,bke->bqk"}> : () -> ()
    %cst_37 = arith.constant dense<0.000000e+00> : vector<2x8x8xf32>
    %78 = tpu.matmul %75, %76, %cst_37 {dimension_numbers = #tpu.dot_dimension_numbers<[2], [2], [1], [1], [0, 0, 0, 1, 1, 1], [0], [0]>} : vector<2x8x8xbf16>, vector<2x8x8xbf16>, vector<2x8x8xf32> -> vector<2x8x8xf32>
    "tpu.trace_stop"() : () -> ()
    %79 = vector.shape_cast %34 : vector<1x8xf32> to vector<1x1x8xf32>
    %80 = vector.broadcast %79 : vector<1x1x8xf32> to vector<2x8x8xf32>
    %81 = arith.addf %78, %80 : vector<2x8x8xf32>
    %cst_38 = arith.constant dense<0xFF800000> : vector<2x8xf32>
    %82 = vector.multi_reduction <maximumf>, %81, %cst_38 [2] : vector<2x8x8xf32> to vector<2x8xf32>
    %83 = vector.shape_cast %82 : vector<2x8xf32> to vector<2x8x1xf32>
    %84 = vector.broadcast %83 : vector<2x8x1xf32> to vector<2x8x8xf32>
    %85 = arith.subf %81, %84 : vector<2x8x8xf32>
    %86 = math.exp %85 : vector<2x8x8xf32>
    %cst_39 = arith.constant dense<0.000000e+00> : vector<2x8xf32>
    %87 = vector.multi_reduction <add>, %86, %cst_39 [2] : vector<2x8x8xf32> to vector<2x8xf32>
    %88 = vector.shape_cast %87 : vector<2x8xf32> to vector<2x8x1xf32>
    %89 = tpu.reciprocal %88 {approx = true} : vector<2x8x1xf32> -> vector<2x8x1xf32>
    %90 = vector.broadcast %89 : vector<2x8x1xf32> to vector<2x8x8xf32>
    %91 = arith.mulf %86, %90 : vector<2x8x8xf32>
    %92 = arith.truncf %91 : vector<2x8x8xf32> to vector<2x8x8xbf16>
    "tpu.trace_start"() <{level = 10 : i32, message = "bqk,bke->bqe"}> : () -> ()
    %cst_40 = arith.constant dense<0.000000e+00> : vector<2x8x8xf32>
    %93 = tpu.matmul %92, %77, %cst_40 {dimension_numbers = #tpu.dot_dimension_numbers<[2], [1], [1], [2], [0, 0, 0, 1, 1, 2], [0], [0]>} : vector<2x8x8xbf16>, vector<2x8x8xbf16>, vector<2x8x8xf32> -> vector<2x8x8xf32>
    "tpu.trace_stop"() : () -> ()
    %94 = vector.shape_cast %93 : vector<2x8x8xf32> to vector<16x8xf32>
    %95 = vector.extract_strided_slice %33 {offsets = [0, 0, 24], sizes = [2, 8, 8], strides = [1, 1, 1]} : vector<2x8x32xbf16> to vector<2x8x8xbf16>
    %96 = vector.extract_strided_slice %25 {offsets = [0, 0, 24], sizes = [2, 8, 8], strides = [1, 1, 1]} : vector<2x8x32xbf16> to vector<2x8x8xbf16>
    %97 = vector.extract_strided_slice %31 {offsets = [0, 0, 24], sizes = [2, 8, 8], strides = [1, 1, 1]} : vector<2x8x32xbf16> to vector<2x8x8xbf16>
    "tpu.trace_start"() <{level = 10 : i32, message = "bqe,bke->bqk"}> : () -> ()
    %cst_41 = arith.constant dense<0.000000e+00> : vector<2x8x8xf32>
    %98 = tpu.matmul %95, %96, %cst_41 {dimension_numbers = #tpu.dot_dimension_numbers<[2], [2], [1], [1], [0, 0, 0, 1, 1, 1], [0], [0]>} : vector<2x8x8xbf16>, vector<2x8x8xbf16>, vector<2x8x8xf32> -> vector<2x8x8xf32>
    "tpu.trace_stop"() : () -> ()
    %99 = vector.shape_cast %34 : vector<1x8xf32> to vector<1x1x8xf32>
    %100 = vector.broadcast %99 : vector<1x1x8xf32> to vector<2x8x8xf32>
    %101 = arith.addf %98, %100 : vector<2x8x8xf32>
    %cst_42 = arith.constant dense<0xFF800000> : vector<2x8xf32>
    %102 = vector.multi_reduction <maximumf>, %101, %cst_42 [2] : vector<2x8x8xf32> to vector<2x8xf32>
    %103 = vector.shape_cast %102 : vector<2x8xf32> to vector<2x8x1xf32>
    %104 = vector.broadcast %103 : vector<2x8x1xf32> to vector<2x8x8xf32>
    %105 = arith.subf %101, %104 : vector<2x8x8xf32>
    %106 = math.exp %105 : vector<2x8x8xf32>
    %cst_43 = arith.constant dense<0.000000e+00> : vector<2x8xf32>
    %107 = vector.multi_reduction <add>, %106, %cst_43 [2] : vector<2x8x8xf32> to vector<2x8xf32>
    %108 = vector.shape_cast %107 : vector<2x8xf32> to vector<2x8x1xf32>
    %109 = tpu.reciprocal %108 {approx = true} : vector<2x8x1xf32> -> vector<2x8x1xf32>
    %110 = vector.broadcast %109 : vector<2x8x1xf32> to vector<2x8x8xf32>
    %111 = arith.mulf %106, %110 : vector<2x8x8xf32>
    %112 = arith.truncf %111 : vector<2x8x8xf32> to vector<2x8x8xbf16>
    "tpu.trace_start"() <{level = 10 : i32, message = "bqk,bke->bqe"}> : () -> ()
    %cst_44 = arith.constant dense<0.000000e+00> : vector<2x8x8xf32>
    %113 = tpu.matmul %112, %97, %cst_44 {dimension_numbers = #tpu.dot_dimension_numbers<[2], [1], [1], [2], [0, 0, 0, 1, 1, 2], [0], [0]>} : vector<2x8x8xbf16>, vector<2x8x8xbf16>, vector<2x8x8xf32> -> vector<2x8x8xf32>
    "tpu.trace_stop"() : () -> ()
    %114 = vector.shape_cast %113 : vector<2x8x8xf32> to vector<16x8xf32>
    %115 = tpu.concatenate %54, %74, %94, %114 in 1 : vector<16x8xf32>, vector<16x8xf32>, vector<16x8xf32>, vector<16x8xf32> -> vector<16x32xf32>
    %116 = arith.truncf %115 : vector<16x32xf32> to vector<16x32xbf16>
    %c0_45 = arith.constant 0 : index
    %c0_46 = arith.constant 0 : index
    %117 = vector.load %arg12[%c0_45, %c0_46] : memref<32x32xbf16, #tpu.memory_space<vmem>>, vector<32x32xbf16>
    %cst_47 = arith.constant dense<0.000000e+00> : vector<16x32xf32>
    %118 = tpu.matmul %116, %117, %cst_47 {dimension_numbers = #tpu.dot_dimension_numbers<[1], [0], [0], [1], [0, 0, 1, 1], [], []>} : vector<16x32xbf16>, vector<32x32xbf16>, vector<16x32xf32> -> vector<16x32xf32>
    %c0_48 = arith.constant 0 : index
    %c0_49 = arith.constant 0 : index
    %119 = vector.load %arg13[%c0_48, %c0_49] : memref<1x32xf32, #tpu.memory_space<vmem>>, vector<1x32xf32>
    %120 = vector.broadcast %119 : vector<1x32xf32> to vector<16x32xf32>
    %121 = arith.addf %118, %120 : vector<16x32xf32>
    %122 = vector.shape_cast %121 : vector<16x32xf32> to vector<2x8x32xf32>
    %c0_50 = arith.constant 0 : index
    %c0_51 = arith.constant 0 : index
    %c0_52 = arith.constant 0 : index
    %123 = vector.load %arg14[%c0_50, %c0_51, %c0_52] : memref<2x8x32xf32, #tpu.memory_space<vmem>>, vector<2x8x32xf32>
    tpu.vector_store %arg14[%c0_50, %c0_51, %c0_52], %122 {strides = array<i32>} : memref<2x8x32xf32, #tpu.memory_space<vmem>>, vector<2x8x32xf32>,
    return
  }
  func.func @transform_0(%arg0: i32) -> (i32, i32, i32) {
    %c0_i32 = arith.constant 0 : i32
    %c0_i32_0 = arith.constant 0 : i32
    %c0_i32_1 = arith.constant 0 : i32
    return %arg0, %c0_i32, %c0_i32_0 : i32, i32, i32
  }
  func.func @transform_1(%arg0: i32) -> (i32, i32, i32) {
    %c0_i32 = arith.constant 0 : i32
    %c0_i32_0 = arith.constant 0 : i32
    %c0_i32_1 = arith.constant 0 : i32
    return %arg0, %c0_i32, %c0_i32_0 : i32, i32, i32
  }
  func.func @transform_2(%arg0: i32) -> (i32, i32) {
    %c0_i32 = arith.constant 0 : i32
    %c0_i32_0 = arith.constant 0 : i32
    %c0_i32_1 = arith.constant 0 : i32
    return %c0_i32, %c0_i32_0 : i32, i32
  }
  func.func @transform_3(%arg0: i32) -> (i32, i32) {
    %c0_i32 = arith.constant 0 : i32
    %c0_i32_0 = arith.constant 0 : i32
    %c0_i32_1 = arith.constant 0 : i32
    return %c0_i32, %c0_i32_0 : i32, i32
  }
  func.func @transform_4(%arg0: i32) -> (i32, i32, i32) {
    %c0_i32 = arith.constant 0 : i32
    %c0_i32_0 = arith.constant 0 : i32
    %c0_i32_1 = arith.constant 0 : i32
    %c0_i32_2 = arith.constant 0 : i32
    return %c0_i32, %c0_i32_0, %c0_i32_1 : i32, i32, i32
  }
  func.func @transform_5(%arg0: i32) -> (i32, i32, i32) {
    %c0_i32 = arith.constant 0 : i32
    %c0_i32_0 = arith.constant 0 : i32
    %c0_i32_1 = arith.constant 0 : i32
    %c0_i32_2 = arith.constant 0 : i32
    return %c0_i32, %c0_i32_0, %c0_i32_1 : i32, i32, i32
  }
  func.func @transform_6(%arg0: i32) -> (i32, i32) {
    %c0_i32 = arith.constant 0 : i32
    %c0_i32_0 = arith.constant 0 : i32
    %c0_i32_1 = arith.constant 0 : i32
    return %c0_i32, %c0_i32_0 : i32, i32
  }
  func.func @transform_7(%arg0: i32) -> (i32, i32) {
    %c0_i32 = arith.constant 0 : i32
    %c0_i32_0 = arith.constant 0 : i32
    %c0_i32_1 = arith.constant 0 : i32
    return %c0_i32, %c0_i32_0 : i32, i32
  }
  func.func @transform_8(%arg0: i32) -> (i32, i32) {
    %c0_i32 = arith.constant 0 : i32
    %c0_i32_0 = arith.constant 0 : i32
    %c0_i32_1 = arith.constant 0 : i32
    return %c0_i32, %c0_i32_0 : i32, i32
  }
  func.func @transform_9(%arg0: i32) -> (i32, i32) {
    %c0_i32 = arith.constant 0 : i32
    %c0_i32_0 = arith.constant 0 : i32
    %c0_i32_1 = arith.constant 0 : i32
    return %c0_i32, %c0_i32_0 : i32, i32
  }
  func.func @transform_10(%arg0: i32) -> (i32, i32) {
    %c0_i32 = arith.constant 0 : i32
    %c0_i32_0 = arith.constant 0 : i32
    %c0_i32_1 = arith.constant 0 : i32
    return %c0_i32, %c0_i32_0 : i32, i32
  }
  func.func @transform_11(%arg0: i32) -> (i32, i32) {
    %c0_i32 = arith.constant 0 : i32
    %c0_i32_0 = arith.constant 0 : i32
    %c0_i32_1 = arith.constant 0 : i32
    return %c0_i32, %c0_i32_0 : i32, i32
  }
  func.func @transform_12(%arg0: i32) -> (i32, i32) {
    %c0_i32 = arith.constant 0 : i32
    %c0_i32_0 = arith.constant 0 : i32
    %c0_i32_1 = arith.constant 0 : i32
    return %c0_i32, %c0_i32_0 : i32, i32
  }
  func.func @transform_13(%arg0: i32) -> (i32, i32, i32) {
    %c0_i32 = arith.constant 0 : i32
    %c0_i32_0 = arith.constant 0 : i32
    %c0_i32_1 = arith.constant 0 : i32
    return %arg0, %c0_i32, %c0_i32_0 : i32, i32, i32
  }
}

</mosaic_0001>

<bundles_post_ra>
// kernel: tpu_custom_call.1
= control target key start
LH: loop header
LB: loop body
LE: loop exit
PB: predicated region body
PF: predicated region fallthrough
CT: control target
= control target key end

     0   :  { %18 = vsyncpa [#allocation3], 0  ;;  %s2553_s0 = inlined_call_operand.hbm [shape: bf16[2,8,32], index: 0, kind: input, shape index: {}]   ;;  %s2554_s1 = inlined_call_operand.hbm [shape: bf16[2,8,32], index: 1, kind: input, shape index: {}]   ;;  %s2555_s2 = inlined_call_operand.hbm [shape: bf16[32,32], index: 2, kind: input, shape index: {}]   ;;  %s2556_s3 = inlined_call_operand.vmem [shape: f32[1,32], index: 3, kind: input, shape index: {}]   ;;  %s2557_s4 = inlined_call_operand.hbm [shape: bf16[2,8,8], index: 4, kind: input, shape index: {}]   ;;  %s2558_s5 = inlined_call_operand.hbm [shape: bf16[2,8,8], index: 5, kind: input, shape index: {}]   ;;  %s2559_s6 = inlined_call_operand.vmem [shape: bf16[32,32], index: 6, kind: input, shape index: {}]   ;;  %s2560_s7 = inlined_call_operand.hbm [shape: f32[8,32], index: 7, kind: input, shape index: {}]   ;;  %s2561_s8 = inlined_call_operand.hbm [shape: bf16[32,32], index: 8, kind: input, shape index: {}]   ;;  %s2562_s9 = inlined_call_operand.hbm [shape: f32[8,32], index: 9, kind: input, shape index: {}]   ;;  %s2563_s10 = inlined_call_operand.vmem [shape: f32[1,8], index: 10, kind: input, shape index: {}]   ;;  %s2564_s11 = inlined_call_operand.vmem [shape: bf16[32,32], index: 11, kind: input, shape index: {}]   ;;  %s2565_s12 = inlined_call_operand.vmem [shape: f32[1,32], index: 12, kind: input, shape index: {}]   ;;  %s2566_s13 = inlined_call_operand.hbm [shape: f32[2,8,32], index: 13, kind: output, shape index: {}]  }
   0x1   :  { %19 = vsyncpa [#allocation6], 0 }
   0x2   :  { %20 = vsyncpa [#allocation9], 0 }
   0x3   :  { %21 = vsyncpa [#allocation12], 0 }
   0x4   :  { %22 = vsyncpa [#allocation15], 0 }
   0x5   :  { %23 = vsyncpa [#allocation4], 0  ;;  %s2076_s25 = smov [#allocation5]   ;;  %s2077_s27 = smov [#allocation8]  }
   0x6   :  { %s41_s26 = sshll.u32 %s2076_s25, 4  ;;  %s67_s28 = sshll.u32 %s2077_s27, 4  ;;  %s42_s26 = int_to_ptr.vmem [resolvable:$true] %s41_s26  ;;  %s2166_s28 = int_to_ptr.vmem [resolvable:$true] %s67_s28 }
   0x7   :  { %s1866_s14 = scalar_lea.hbm %s2554_s1, 128 }
   0x8   :  { %p1867_p0 = scmp.ne.s32.totalorder %s2554_s1, %s1866_s14  ;;  %p1870_p1 = scmp.lt.u32.totalorder %s1866_s14, %s2554_s1 }
   0xa   :  { %p1872_p2 = pnand %p1870_p1, %p1867_p0 }
   0xc   :  { %1875 = shalt.err (!%p1872_p2)
}
   0xd   :  { %s1876_s19 = scalar_lea.vmem %s42_s26, 128  ;;  %p1881_p4 = scmp.lt.s32.totalorder %s42_s26, %s42_s26 }
   0xe   :  { %p1877_p3 = scmp.ne.s32.totalorder %s42_s26, %s1876_s19  ;;  %p1882_p5 = scmp.lt.s32.totalorder %s1876_s19, %s1876_s19 }
  0x10   :  { %p1883_p6 = por %p1882_p5, %p1881_p4 }
  0x12   :  { %p1884_p7 = pnand %p1883_p6, %p1877_p3 }
  0x14   :  { %1887 = shalt.err (!%p1884_p7)
}
  0x15   :  { %s2078_s20 = smov 64   ;;  %s2079_s21 = smov 4  }
  0x16   :  { %47 = dma.hbm_to_vmem [thread:$0]  %s2554_s1, 128, %s42_s26, [#allocation6], %s2078_s20, %s2078_s20, %s2079_s21  }
  0x17   :  { %s1888_s27 = scalar_lea.hbm %s2557_s4, 128 }
  0x18   :  { %p1889_p8 = scmp.ne.s32.totalorder %s2557_s4, %s1888_s27  ;;  %p1892_p9 = scmp.lt.u32.totalorder %s1888_s27, %s2557_s4 }
  0x1a   :  { %p1894_p10 = pnand %p1892_p9, %p1889_p8 }
  0x1c   :  { %1897 = shalt.err (!%p1894_p10)
}
  0x1d   :  { %s1898_s16 = scalar_lea.vmem %s2166_s28, 128  ;;  %p1903_p12 = scmp.lt.s32.totalorder %s2166_s28, %s2166_s28 }
  0x1e   :  { %p1899_p11 = scmp.ne.s32.totalorder %s2166_s28, %s1898_s16  ;;  %p1904_p13 = scmp.lt.s32.totalorder %s1898_s16, %s1898_s16 }
  0x20   :  { %p1905_p0 = por %p1904_p13, %p1903_p12 }
  0x22   :  { %p1906_p1 = pnand %p1905_p0, %p1899_p11 }
  0x24   :  { %1909 = shalt.err (!%p1906_p1)
}
  0x25   :  { %73 = dma.hbm_to_vmem [thread:$0]  %s2557_s4, 128, %s2166_s28, [#allocation9], %s2078_s20, %s2078_s20, %s2079_s21  }
  0x26   :  { %s2080_s17 = smov [#allocation11]   ;;  %s2081_s19 = smov [#allocation2]  }
  0x27   :  { %s94_s18 = sshll.u32 %s2080_s17, 4  ;;  %s29_s22 = sshll.u32 %s2081_s19, 4  ;;  %s95_s18 = int_to_ptr.vmem [resolvable:$true] %s94_s18  ;;  %s2203_s22 = int_to_ptr.vmem [resolvable:$true] %s29_s22 }
  0x28   :  { %s1910_s25 = scalar_lea.hbm %s2560_s7, 128 }
  0x29   :  { %p1911_p2 = scmp.ne.s32.totalorder %s2560_s7, %s1910_s25  ;;  %p1914_p3 = scmp.lt.u32.totalorder %s1910_s25, %s2560_s7 }
  0x2b   :  { %p1916_p4 = pnand %p1914_p3, %p1911_p2 }
  0x2d   :  { %1919 = shalt.err (!%p1916_p4)
}
  0x2e   :  { %s1920_s4 = scalar_lea.vmem %s95_s18, 128  ;;  %p1925_p6 = scmp.lt.s32.totalorder %s95_s18, %s95_s18 }
  0x2f   :  { %p1921_p5 = scmp.ne.s32.totalorder %s95_s18, %s1920_s4  ;;  %p1926_p7 = scmp.lt.s32.totalorder %s1920_s4, %s1920_s4 }
  0x31   :  { %p1927_p8 = por %p1926_p7, %p1925_p6 }
  0x33   :  { %p1928_p9 = pnand %p1927_p8, %p1921_p5 }
  0x35   :  { %1931 = shalt.err (!%p1928_p9)
}
  0x36   :  { %97 = dma.hbm_to_vmem [thread:$0]  %s2560_s7, 128, %s95_s18, [#allocation12]  }
  0x37   :  { %s1932_s26 = scalar_lea.hbm %s2553_s0, 128 }
  0x38   :  { %p1933_p10 = scmp.ne.s32.totalorder %s2553_s0, %s1932_s26  ;;  %p1936_p11 = scmp.lt.u32.totalorder %s1932_s26, %s2553_s0 }
  0x3a   :  { %p1938_p12 = pnand %p1936_p11, %p1933_p10 }
  0x3c   :  { %1941 = shalt.err (!%p1938_p12)
}
  0x3d   :  { %s1942_s25 = scalar_lea.vmem %s2203_s22, 128  ;;  %p1947_p0 = scmp.lt.s32.totalorder %s2203_s22, %s2203_s22 }
  0x3e   :  { %p1943_p13 = scmp.ne.s32.totalorder %s2203_s22, %s1942_s25  ;;  %p1948_p1 = scmp.lt.s32.totalorder %s1942_s25, %s1942_s25 }
  0x40   :  { %p1949_p2 = por %p1948_p1, %p1947_p0 }
  0x42   :  { %p1950_p3 = pnand %p1949_p2, %p1943_p13 }
  0x44   :  { %1953 = shalt.err (!%p1950_p3)
}
  0x45   :  { %35 = dma.hbm_to_vmem [thread:$0]  %s2553_s0, 128, %s2203_s22, [#allocation3], %s2078_s20, %s2078_s20, %s2079_s21  }
  0x46   :  { %s2082_s27 = smov [#allocation7]   ;;  %s2083_s30 = smov [#allocation10]  }
  0x47   :  { %s53_s29 = sshll.u32 %s2082_s27, 4  ;;  %s79_s14 = sshll.u32 %s2083_s30, 4  ;;  %s54_s29 = int_to_ptr.vmem [resolvable:$true] %s53_s29  ;;  %s2237_s14 = int_to_ptr.vmem [resolvable:$true] %s79_s14 }
  0x48   :  { %s1954_s15 = scalar_lea.hbm %s2555_s2, 256 }
  0x49   :  { %p1955_p4 = scmp.ne.s32.totalorder %s2555_s2, %s1954_s15  ;;  %p1958_p5 = scmp.lt.u32.totalorder %s1954_s15, %s2555_s2 }
  0x4b   :  { %p1960_p6 = pnand %p1958_p5, %p1955_p4 }
  0x4d   :  { %1963 = shalt.err (!%p1960_p6)
}
  0x4e   :  { %s1964_s0 = scalar_lea.vmem %s54_s29, 256  ;;  %p1969_p8 = scmp.lt.s32.totalorder %s54_s29, %s54_s29 }
  0x4f   :  { %p1965_p7 = scmp.ne.s32.totalorder %s54_s29, %s1964_s0  ;;  %p1970_p9 = scmp.lt.s32.totalorder %s1964_s0, %s1964_s0 }
  0x51   :  { %p1971_p10 = por %p1970_p9, %p1969_p8 }
  0x53   :  { %p1972_p11 = pnand %p1971_p10, %p1965_p7 }
  0x55   :  { %1975 = shalt.err (!%p1972_p11)
}
  0x56   :  { %59 = dma.hbm_to_vmem [thread:$0]  %s2555_s2, 256, %s54_s29, [#allocation6], %s2078_s20, %s2078_s20, %s2079_s21  }
  0x57   :  { %s1976_s25 = scalar_lea.hbm %s2558_s5, 128 }
  0x58   :  { %p1977_p12 = scmp.ne.s32.totalorder %s2558_s5, %s1976_s25  ;;  %p1980_p13 = scmp.lt.u32.totalorder %s1976_s25, %s2558_s5 }
  0x5a   :  { %p1982_p0 = pnand %p1980_p13, %p1977_p12 }
  0x5c   :  { %1985 = shalt.err (!%p1982_p0)
}
  0x5d   :  { %s1986_s4 = scalar_lea.vmem %s2237_s14, 128  ;;  %p1991_p2 = scmp.lt.s32.totalorder %s2237_s14, %s2237_s14 }
  0x5e   :  { %p1987_p1 = scmp.ne.s32.totalorder %s2237_s14, %s1986_s4  ;;  %p1992_p3 = scmp.lt.s32.totalorder %s1986_s4, %s1986_s4 }
  0x60   :  { %p1993_p4 = por %p1992_p3, %p1991_p2 }
  0x62   :  { %p1994_p5 = pnand %p1993_p4, %p1987_p1 }
  0x64   :  { %1997 = shalt.err (!%p1994_p5)
}
  0x65   :  { %85 = dma.hbm_to_vmem [thread:$0]  %s2558_s5, 128, %s2237_s14, [#allocation9], %s2078_s20, %s2078_s20, %s2079_s21  }
  0x66   :  { %s2084_s28 = smov [#allocation13]   ;;  %s2085_s16 = smov [#allocation14]  }
  0x67   :  { %s103_s15 = sshll.u32 %s2084_s28, 4  ;;  %s116_s1 = sshll.u32 %s2085_s16, 4  ;;  %s104_s15 = int_to_ptr.vmem [resolvable:$true] %s103_s15  ;;  %s117_s1 = int_to_ptr.vmem [resolvable:$true] %s116_s1 }
  0x68   :  { %s1998_s0 = scalar_lea.hbm %s2561_s8, 256 }
  0x69   :  { %p1999_p6 = scmp.ne.s32.totalorder %s2561_s8, %s1998_s0  ;;  %p2002_p7 = scmp.lt.u32.totalorder %s1998_s0, %s2561_s8 }
  0x6b   :  { %p2004_p8 = pnand %p2002_p7, %p1999_p6 }
  0x6d   :  { %2007 = shalt.err (!%p2004_p8)
}
  0x6e   :  { %s2008_s5 = scalar_lea.vmem %s104_s15, 256  ;;  %p2013_p10 = scmp.lt.s32.totalorder %s104_s15, %s104_s15 }
  0x6f   :  { %p2009_p9 = scmp.ne.s32.totalorder %s104_s15, %s2008_s5  ;;  %p2014_p11 = scmp.lt.s32.totalorder %s2008_s5, %s2008_s5 }
  0x71   :  { %p2015_p12 = por %p2014_p11, %p2013_p10 }
  0x73   :  { %p2016_p13 = pnand %p2015_p12, %p2009_p9 }
  0x75   :  { %2019 = shalt.err (!%p2016_p13)
}
  0x76   :  { %109 = dma.hbm_to_vmem [thread:$0]  %s2561_s8, 256, %s104_s15, [#allocation12], %s2078_s20, %s2078_s20, %s2079_s21  }
  0x77   :  { %s2020_s27 = scalar_lea.hbm %s2562_s9, 128 }
  0x78   :  { %p2021_p0 = scmp.ne.s32.totalorder %s2562_s9, %s2020_s27  ;;  %p2024_p1 = scmp.lt.u32.totalorder %s2020_s27, %s2562_s9 }
  0x7a   :  { %p2026_p2 = pnand %p2024_p1, %p2021_p0 }
  0x7c   :  { %2029 = shalt.err (!%p2026_p2)
}
  0x7d   :  { %s2030_s28 = scalar_lea.vmem %s117_s1, 128  ;;  %p2035_p4 = scmp.lt.s32.totalorder %s117_s1, %s117_s1 }
  0x7e   :  { %p2031_p3 = scmp.ne.s32.totalorder %s117_s1, %s2030_s28  ;;  %p2036_p5 = scmp.lt.s32.totalorder %s2030_s28, %s2030_s28 }
  0x80   :  { %p2037_p6 = por %p2036_p5, %p2035_p4 }
  0x82   :  { %p2038_p7 = pnand %p2037_p6, %p2031_p3 }
  0x84   :  { %2041 = shalt.err (!%p2038_p7)
}
  0x85   :  { %119 = dma.hbm_to_vmem [thread:$0]  %s2562_s9, 128, %s117_s1, [#allocation15]  }
  0x86   :  { %2064 = dma.done.wait [#allocation3], 128  }
  0x87   :  { %2065 = vsyncadd [#allocation3], 4294967168 }
  0x88   :  { %2066 = dma.done.wait [#allocation6], 384  }
  0x89   :  { %2067 = vsyncadd [#allocation6], 4294966912 }
  0x8a   :  { %2068 = dma.done.wait [#allocation9], 256  }
  0x8b   :  { %2069 = vsyncadd [#allocation9], 4294967040 }
  0x8c   :  { %2070 = dma.done.wait [#allocation12], 384  }
  0x8d   :  { %2071 = vsyncadd [#allocation12], 4294966912 }
  0x8e   :  { %2072 = dma.done.wait [#allocation15], 128  }
  0x8f   :  { %2073 = vsyncadd [#allocation15], 4294967168  ;;  %v2086_v0 = vmov 0.0   ;;  %vm2087_vm0 = vmmov 0   ;;  %vm234_vm1 = vcmask 1043456   ;;  %vm230_vm2 = vcmask 64512  }
  0x90   :  { %1646 = vmatprep.subr.bf16.mxu1 %v2086_v0  ;;  %1648 = vmatprep.mubr.msk.bf16.mxu1 %vm2087_vm0, %v2086_v0  ;;  %v226_v1 = vld [vmem:[#allocation5] sm:$0xf]  ;;  %v227_v2 = vld [vmem:[#allocation5 + $0x4] sm:$0xf]  ;;  %v228_v4 = vld [vmem:[#allocation8] sm:$0xf] }
  0x91   :  { %1638 = vmatprep.subr.bf16.mxu0 %v2086_v0  ;;  %1642 = vmatprep.mubr.msk.bf16.mxu0 %vm2087_vm0, %v2086_v0  ;;  %v236_v3 = vsel %vm234_vm1, %v226_v1, 0  ;;  %v1825_v5 = vld [vmem:[#allocation7] sm:$0xff]   ;;  %v282_v6 = vsel %vm234_vm1, %v227_v2, 0  ;;  %v1826_v7 = vld [vmem:[#allocation7 + $0x8] sm:$0xff]   ;;  %v1827_v8 = vld [vmem:[#allocation2] sm:$0xff]   ;;  %vm181_vm3 = vcmask 261120  }
  0x92   :  { %1647 = vmatpush3.bf16.msra.mxu1 %v236_v3  ;;  %1639 = vmatpush3.bf16.msra.mxu0 %v1825_v5  ;;  %v229_v9 = vld [vmem:[#allocation8 + $0x4] sm:$0xf]  ;;  %v324_v10 = vld [vmem:[#allocation10] sm:$0xf]  ;;  %v325_v11 = vld [vmem:[#allocation10 + $0x4] sm:$0xf] }
  0x93   :  { %1652 = vmatprep.subr.bf16.mxu1 %v2086_v0  ;;  %1640 = vmatprep.subr.bf16.mxu0 %v2086_v0  ;;  %v1828_v12 = vld [vmem:[%s2559_s6] sm:$0xff]   ;;  %v1829_v13 = vld [vmem:[%s2559_s6 + $0x8] sm:$0xff]   ;;  %v1830_v14 = vld [vmem:[#allocation13] sm:$0xff]   ;;  %s2088_s26 = smov 120   ;;  %s2090_s0 = smov 104   ;;  %vm1453_vm4 = vcmask 130048  }
  0x94   :  { %v1831_v15 = vld [vmem:[#allocation13 + $0x8] sm:$0xff]   ;;  %v534_v38 = vld [vmem:[#allocation11] sm:$0xff]  ;;  %v539_v54 = vld [vmem:[#allocation14] sm:$0xff]  ;;  %s2091_s22 = smov 8   ;;  %s2092_s19 = smov 16   ;;  %vm1456_vm5 = vcmask 195584  }
  0x95   :  { %1649 = vmatmul.mubr.msk.bf16.vlgmr.msra.gmra.mrb[0].mxu1 %vm230_vm2, %v228_v4  ;;  %v1550_v46 = vld [vmem:[%s2556_s3] ss:$0 sm:$0xff]  ;;  %s2093_s25 = smov 24   ;;  %s2094_s18 = smov [#allocation16]  }
  0x96   :  { %1653 = vmatpush3.bf16.msra.mxu1 %v282_v6  ;;  %1654 = vmatprep.mubr.msk.bf16.mxu1 %vm2087_vm0, %v2086_v0  ;;  %v2386_v2 = vld [vmem:[%s2563_s10] ss:$0 sm:$0xff]  ;;  %s2089_s10 = smov 112   ;;  %s1534_s27 = sshll.u32 %s2094_s18, 4  ;;  %s1535_s27 = int_to_ptr.vmem [resolvable:$true] %s1534_s27 }
  0x97   :  { %1664 = vmatprep.subr.bf16.mxu1 %v2086_v0  ;;  %1641 = vmatpush3.bf16.msra.mxu0 %v1826_v7  ;;  %s2042_s30 = scalar_lea.vmem %s1535_s27, 256  ;;  %p2047_p9 = scmp.lt.s32.totalorder %s1535_s27, %s1535_s27 }
  0x98   :  { %1658 = vmatprep.subr.bf16.mxu0 %v2086_v0  ;;  %p2043_p8 = scmp.ne.s32.totalorder %s1535_s27, %s2042_s30  ;;  %p2048_p10 = scmp.lt.s32.totalorder %s2042_s30, %s2042_s30 }
  0x9a   :  { %1643 = vmatmul.mubr.msk.bf16.vlgmr.msra.gmra.mrb[0].mxu0 %vm181_vm3, %v1827_v8  ;;  %p2049_p11 = por %p2048_p10, %p2047_p9 }
  0x9b   :  { %1659 = vmatpush3.bf16.msra.mxu0 %v236_v3  ;;  %1660 = vmatprep.mubr.msk.bf16.mxu0 %vm2087_vm0, %v2086_v0 }
  0x9c   :  { %1670 = vmatprep.subr.bf16.mxu0 %v2086_v0  ;;  %p2050_p12 = pnand %p2049_p11, %p2043_p8 }
  0x9d   :  { %1655 = vmatmul.mubr.msk.bf16.vlgmr.msra.gmra.mrb[4].mxu1 %vm230_vm2, %v229_v9 }
  0x9e   :  { %1665 = vmatpush3.bf16.msra.mxu1 %v282_v6  ;;  %1666 = vmatprep.mubr.msk.bf16.mxu1 %vm2087_vm0, %v2086_v0 }
  0x9f   :  { %1678 = vmatprep.subr.bf16.mxu1 %v2086_v0 }
  0xa2   :  { %1661 = vmatmul.mubr.msk.bf16.vlgmr.msra.gmra.mrb[4].mxu0 %vm230_vm2, %v324_v10 }
  0xa3   :  { %1674 = vmatprep.mubr.msk.bf16.mxu0 %vm2087_vm0, %v2086_v0  ;;  %1671 = vmatpush3.bf16.msra.mxu0 %v1828_v12 }
  0xa4   :  { %1672 = vmatprep.subr.bf16.mxu0 %v2086_v0 }
  0xa5   :  { %1667 = vmatmul.mubr.msk.bf16.vlgmr.msra.gmra.mrb[8].mxu1 %vm230_vm2, %v325_v11 }
  0xa6   :  { %1682 = vmatprep.mubr.msk.bf16.mxu1 %vm2087_vm0, %v2086_v0  ;;  %1679 = vmatpush3.bf16.msra.mxu1 %v1830_v14 }
  0xa7   :  { %1673 = vmatpush3.bf16.msra.mxu0 %v1829_v13  ;;  %1680 = vmatprep.subr.bf16.mxu1 %v2086_v0 }
  0xa8   :  { %1686 = vmatprep.subr.bf16.mxu0 %v2086_v0 }
  0xaa   :  { %1681 = vmatpush3.bf16.msra.mxu1 %v1831_v15 }
  0xab   :  { %1692 = vmatprep.subr.bf16.mxu1 %v2086_v0 }
 0x168   :  { %v272_v16 = vpop.f32.mrb[0].mxu1 }
 0x169   :  { %v1650_v17 = vpop.f32.mrb[1].mxu1 }
 0x16a   :  { %v275_v18 = vpop.f32.mrb[2].mxu1 }
 0x16b   :  { %v1651_v19 = vpop.f32.mrb[3].mxu1 }
 0x16d   :  { %v219_v20 = vpop.f32.mrb[0].mxu0 }
 0x16e   :  { %v1644_v21 = vpop.f32.mrb[1].mxu0  ;;  %v220_v49 = vadd.f32 %v1550_v46, %v219_v20 }
 0x16f   :  { %v222_v23 = vpop.f32.mrb[2].mxu0 }
 0x170   :  { %v318_v22 = vpop.f32.mrb[4].mxu1  ;;  %v1645_v26 = vpop.f32.mrb[3].mxu0  ;;  %v223_v51 = vadd.f32 %v1550_v46, %v222_v23  ;;  %v2361_v52 = vpack.c.bf16 %v220_v49, %v220_v49 }
 0x171   :  { %v412_v24 = vpack.c.bf16 %v318_v22, %v272_v16  ;;  %v1656_v25 = vpop.f32.mrb[5].mxu1 }
 0x172   :  { %v321_v27 = vpop.f32.mrb[6].mxu1  ;;  %v2363_v53 = vpack.c.bf16 %v223_v51, %v223_v51 }
 0x173   :  { %v1657_v28 = vpop.f32.mrb[7].mxu1  ;;  %1675 = vmatmul.mubr.msk.bf16.vlgmr.msra.gmra.mrb[8].mxu0 %vm181_vm3, %v412_v24 }
 0x174   :  { %1688 = vmatprep.mubr.msk.bf16.mxu0 %vm2087_vm0, %v2086_v0 }
 0x175   :  { %v363_v29 = vpop.f32.mrb[4].mxu0 }
 0x176   :  { %v1662_v32 = vpop.f32.mrb[5].mxu0 }
 0x177   :  { %v366_v34 = vpop.f32.mrb[6].mxu0 }
 0x178   :  { %v406_v30 = vpop.f32.mrb[8].mxu1  ;;  %v1663_v36 = vpop.f32.mrb[7].mxu0 }
 0x179   :  { %v473_v31 = vpack.c.bf16 %v406_v30, %v363_v29  ;;  %v1668_v33 = vpop.f32.mrb[9].mxu1 }
 0x17a   :  { %v409_v35 = vpop.f32.mrb[10].mxu1 }
 0x17b   :  { %1683 = vmatmul.mubr.msk.bf16.vlgmr.msra.gmra.mrb[12].mxu1 %vm181_vm3, %v473_v31  ;;  %v1669_v37 = vpop.f32.mrb[11].mxu1 }
 0x17c   :  { %1694 = vmatprep.mubr.msk.bf16.mxu1 %vm2087_vm0, %v2086_v0 }
 0x246   :  { %v466_v39 = vpop.f32.mrb[8].mxu0 }
 0x247   :  { %v535_v40 = vadd.f32 %v534_v38, %v466_v39  ;;  %v1676_v41 = vpop.f32.mrb[9].mxu0 }
 0x248   :  { %v469_v42 = vpop.f32.mrb[10].mxu0 }
 0x249   :  { %v2346_v43 = vpack.c.bf16 %v535_v40, %v535_v40  ;;  %v536_v44 = vadd.f32 %v534_v38, %v469_v42  ;;  %v1677_v45 = vpop.f32.mrb[11].mxu0 }
 0x24b   :  { %v2351_v47 = vpack.c.bf16 %v536_v44, %v536_v44  ;;  %v557_v48 = vsel %vm230_vm2, %v2346_v43, 0 }
 0x24c   :  { %1687 = vmatpush3.bf16.xpose.msra.mxu0 %v557_v48 }
 0x24d   :  { %817 = vrot.lane.b32.xlu1 %v2351_v47, %s2088_s26  ;;  %v603_v50 = vsel %vm230_vm2, %v2351_v47, 0  ;;  %1698 = vmatprep.subr.bf16.mxu0 %v2086_v0 }
 0x24e   :  { %1693 = vmatpush3.bf16.xpose.msra.mxu1 %v603_v50  ;;  %v527_v55 = vpop.f32.mrb[12].mxu1 }
 0x24f   :  { %1704 = vmatprep.subr.bf16.mxu1 %v2086_v0  ;;  %v540_v56 = vadd.f32 %v539_v54, %v527_v55  ;;  %v1684_v57 = vpop.f32.mrb[13].mxu1 }
 0x250   :  { %v530_v58 = vpop.f32.mrb[14].mxu1 }
 0x251   :  { %v2373_v59 = vpack.c.bf16 %v540_v56, %v540_v56  ;;  %v541_v60 = vadd.f32 %v539_v54, %v530_v58  ;;  %v1685_v61 = vpop.f32.mrb[15].mxu1 }
 0x253   :  { %1689 = vmatmul.mubr.msk.bf16.vlgmr.msra.gmra.mrb[12].mxu0 %vm230_vm2, %v2361_v52  ;;  %v2375_v62 = vpack.c.bf16 %v541_v60, %v541_v60  ;;  %v673_v63 = vsel %vm234_vm1, %v2373_v59, 0 }
 0x254   :  { %1700 = vmatprep.mubr.msk.bf16.mxu0 %vm2087_vm0, %v2086_v0  ;;  %1699 = vmatpush3.bf16.msra.mxu0 %v673_v63 }
 0x255   :  { %1695 = vmatmul.mubr.msk.bf16.vlgmr.msra.gmra.mrb[16].mxu1 %vm230_vm2, %v2363_v53  ;;  %v719_v1 = vsel %vm234_vm1, %v2375_v62, 0  ;;  %1710 = vmatprep.subr.bf16.mxu0 %v2086_v0 }
 0x256   :  { %1706 = vmatprep.mubr.msk.bf16.mxu1 %vm2087_vm0, %v2086_v0  ;;  %1705 = vmatpush3.bf16.msra.mxu1 %v719_v1 }
 0x257   :  { %1716 = vmatprep.subr.bf16.mxu1 %v2086_v0 }
 0x2bf   :  { %v818_v25 = vpop.permute.xlu1 %817 }
 0x2c0   :  { %v823_v36 = vsel %vm230_vm2, %v818_v25, 0 }
 0x326   :  { %v593_v3 = vpop.f32.mrb[12].mxu0 }
 0x327   :  { %v594_v4 = vadd.f32 %v2386_v2, %v593_v3  ;;  %v1690_v5 = vpop.f32.mrb[13].mxu0 }
 0x328   :  { %v596_v6 = vpop.f32.mrb[14].mxu0  ;;  %v639_v7 = vpop.f32.mrb[16].mxu1 }
 0x329   :  { %v640_v8 = vadd.f32 %v2386_v2, %v639_v7  ;;  %v1691_v9 = vpop.f32.mrb[15].mxu0  ;;  %v1696_v10 = vpop.f32.mrb[17].mxu1  ;;  %v645_v11 = vsel %vm230_vm2, %v594_v4, -inf }
 0x32a   :  { %v642_v12 = vpop.f32.mrb[18].mxu1  ;;  %646 = vmax.xlane.f32.xlu0 %v645_v11 }
 0x32b   :  { %v1697_v13 = vpop.f32.mrb[19].mxu1  ;;  %v648_v14 = vsel %vm230_vm2, %v640_v8, -inf }
 0x32e   :  { %649 = vmax.xlane.f32.xlu0 %v648_v14 }
 0x344   :  { %765 = vrot.lane.b32.xlu0 %v2346_v43, %s2088_s26 }
 0x3b7   :  { %v647_v15 = vpop.xlane.xlu0 %646 }
 0x3b8   :  { %v651_v16 = vsub.f32 %v594_v4, %v647_v15 }
 0x3ba   :  { %v653_v17 = vmul.f32 1.442695, %v651_v16 }
 0x3bb   :  { %v650_v18 = vpop.xlane.xlu0 %649 }
 0x3bc   :  { %1834 = vpow2.f32 %v653_v17  ;;  %v652_v19 = vsub.f32 %v640_v8, %v650_v18 }
 0x3be   :  { %v655_v20 = vmul.f32 1.442695, %v652_v19 }
 0x3bf   :  { %v766_v30 = vpop.permute.xlu0 %765 }
 0x3c0   :  { %1836 = vpow2.f32 %v655_v20  ;;  %v771_v33 = vsel %vm230_vm2, %v766_v30, 0 }
 0x3c6   :  { %v1835_v21 = vpop.eup %1834 }
 0x3c7   :  { %v657_v22 = vsel %vm230_vm2, %v1835_v21, 0.0 }
 0x3c8   :  { %658 = vadd.xlane.f32.xlu1 %v657_v22 }
 0x3ca   :  { %v1837_v23 = vpop.eup %1836 }
 0x3cb   :  { %v660_v24 = vsel %vm230_vm2, %v1837_v23, 0.0 }
 0x3cc   :  { %661 = vadd.xlane.f32.xlu1 %v660_v24 }
 0x3dd   :  { %762 = vrot.lane.b32.xlu1 %v2361_v52, %s2088_s26 }
 0x3e1   :  { %814 = vrot.lane.b32.xlu1 %v2363_v53, %s2088_s26 }
 0x455   :  { %v659_v26 = vpop.xlane.xlu1 %658 }
 0x456   :  { %1838 = vrcp.f32 %v659_v26 }
 0x459   :  { %v662_v27 = vpop.xlane.xlu1 %661 }
 0x45a   :  { %1840 = vrcp.f32 %v662_v27 }
 0x45d   :  { %v763_v37 = vpop.permute.xlu1 %762 }
 0x460   :  { %v1839_v28 = vpop.eup %1838 }
 0x461   :  { %v665_v29 = vmul.f32 %v1839_v28, %v1835_v21  ;;  %v815_v38 = vpop.permute.xlu1 %814 }
 0x463   :  { %v667_v31 = vpack.c.bf16 %v665_v29, %v665_v29 }
 0x464   :  { %v1841_v32 = vpop.eup %1840 }
 0x465   :  { %v666_v34 = vmul.f32 %v1841_v32, %v1837_v23  ;;  %1701 = vmatmul.mubr.msk.bf16.vlgmr.msra.gmra.mrb[16].mxu0 %vm230_vm2, %v667_v31 }
 0x466   :  { %1711 = vmatpush3.bf16.xpose.msra.mxu0 %v771_v33  ;;  %1712 = vmatprep.mubr.msk.bf16.mxu0 %vm2087_vm0, %v2086_v0 }
 0x467   :  { %v668_v35 = vpack.c.bf16 %v666_v34, %v666_v34  ;;  %1722 = vmatprep.subr.bf16.mxu0 %v2086_v0 }
 0x469   :  { %1707 = vmatmul.mubr.msk.bf16.vlgmr.msra.gmra.mrb[20].mxu1 %vm230_vm2, %v668_v35 }
 0x46a   :  { %1717 = vmatpush3.bf16.xpose.msra.mxu1 %v823_v36  ;;  %1718 = vmatprep.mubr.msk.bf16.mxu1 %vm2087_vm0, %v2086_v0 }
 0x46b   :  { %1728 = vmatprep.subr.bf16.mxu1 %v2086_v0 }
 0x46d   :  { %1713 = vmatmul.mubr.msk.bf16.vlgmr.msra.gmra.mrb[20].mxu0 %vm230_vm2, %v763_v37 }
 0x46e   :  { %1724 = vmatprep.mubr.msk.bf16.mxu0 %vm2087_vm0, %v2086_v0 }
 0x471   :  { %1719 = vmatmul.mubr.msk.bf16.vlgmr.msra.gmra.mrb[24].mxu1 %vm230_vm2, %v815_v38 }
 0x472   :  { %1730 = vmatprep.mubr.msk.bf16.mxu1 %vm2087_vm0, %v2086_v0 }
 0x538   :  { %v2416_v39 = vpop.f32.mrb[16].mxu0 }
 0x539   :  { %v1702_v40 = vpop.f32.mrb[17].mxu0 }
 0x53a   :  { %v712_v41 = vpop.f32.mrb[18].mxu0 }
 0x53b   :  { %v1703_v42 = vpop.f32.mrb[19].mxu0 }
 0x53c   :  { %v2418_v44 = vpop.f32.mrb[20].mxu1 }
 0x53d   :  { %v1708_v45 = vpop.f32.mrb[21].mxu1 }
 0x53e   :  { %v758_v46 = vpop.f32.mrb[22].mxu1 }
 0x53f   :  { %v1709_v48 = vpop.f32.mrb[23].mxu1 }
 0x540   :  { %v807_v49 = vpop.f32.mrb[20].mxu0 }
 0x541   :  { %v808_v50 = vadd.f32 %v2386_v2, %v807_v49  ;;  %v1714_v51 = vpop.f32.mrb[21].mxu0 }
 0x542   :  { %v810_v54 = vpop.f32.mrb[22].mxu0 }
 0x543   :  { %v1715_v55 = vpop.f32.mrb[23].mxu0  ;;  %v865_v56 = vsel %vm230_vm2, %v808_v50, -inf }
 0x544   :  { %v859_v57 = vpop.f32.mrb[24].mxu1  ;;  %866 = vmax.xlane.f32.xlu0 %v865_v56 }
 0x545   :  { %v860_v58 = vadd.f32 %v2386_v2, %v859_v57  ;;  %v1720_v60 = vpop.f32.mrb[25].mxu1 }
 0x546   :  { %v862_v61 = vpop.f32.mrb[26].mxu1 }
 0x547   :  { %v1721_v63 = vpop.f32.mrb[27].mxu1  ;;  %v868_v1 = vsel %vm230_vm2, %v860_v58, -inf }
 0x548   :  { %869 = vmax.xlane.f32.xlu1 %v868_v1 }
 0x559   :  { %939 = vrot.lane.b32.xlu1 %v2375_v62, %s2088_s26 }
 0x55d   :  { %989 = vrot.lane.b32.xlu1 %v2346_v43, %s2089_s10 }
 0x561   :  { %1039 = vrot.lane.b32.xlu1 %v2351_v47, %s2089_s10 }
 0x565   :  { %1037 = vrot.lane.b32.xlu1 %v2363_v53, %s2089_s10 }
 0x5d1   :  { %v867_v3 = vpop.xlane.xlu0 %866 }
 0x5d2   :  { %v871_v4 = vsub.f32 %v808_v50, %v867_v3 }
 0x5d4   :  { %v873_v5 = vmul.f32 1.442695, %v871_v4 }
 0x5d5   :  { %v870_v6 = vpop.xlane.xlu1 %869 }
 0x5d6   :  { %1842 = vpow2.f32 %v873_v5  ;;  %v872_v7 = vsub.f32 %v860_v58, %v870_v6 }
 0x5d8   :  { %v875_v8 = vmul.f32 1.442695, %v872_v7 }
 0x5d9   :  { %v940_v9 = vpop.permute.xlu1 %939 }
 0x5da   :  { %1844 = vpow2.f32 %v875_v8  ;;  %v945_v10 = vsel %vm234_vm1, %v940_v9, 0 }
 0x5db   :  { %1729 = vmatpush3.bf16.msra.mxu1 %v945_v10 }
 0x5dc   :  { %1740 = vmatprep.subr.bf16.mxu1 %v2086_v0 }
 0x5dd   :  { %v990_v20 = vpop.permute.xlu1 %989 }
 0x5de   :  { %v995_v26 = vsel %vm230_vm2, %v990_v20, 0 }
 0x5e0   :  { %v1843_v11 = vpop.eup %1842 }
 0x5e1   :  { %v877_v12 = vsel %vm230_vm2, %v1843_v11, 0.0  ;;  %v1040_v25 = vpop.permute.xlu1 %1039 }
 0x5e2   :  { %878 = vadd.xlane.f32.xlu0 %v877_v12  ;;  %v1045_v28 = vsel %vm230_vm2, %v1040_v25, 0 }
 0x5e4   :  { %v1845_v13 = vpop.eup %1844 }
 0x5e5   :  { %v880_v14 = vsel %vm230_vm2, %v1845_v13, 0.0  ;;  %v1038_v30 = vpop.permute.xlu1 %1037 }
 0x5e6   :  { %881 = vadd.xlane.f32.xlu0 %v880_v14 }
 0x5fc   :  { %890 = vrot.lane.b32.xlu0 %v2373_v59, %s2088_s26 }
 0x600   :  { %987 = vrot.lane.b32.xlu0 %v2361_v52, %s2089_s10 }
 0x66f   :  { %v879_v15 = vpop.xlane.xlu0 %878 }
 0x670   :  { %1846 = vrcp.f32 %v879_v15 }
 0x673   :  { %v882_v16 = vpop.xlane.xlu0 %881 }
 0x674   :  { %1848 = vrcp.f32 %v882_v16 }
 0x677   :  { %v891_v17 = vpop.permute.xlu0 %890 }
 0x678   :  { %v896_v18 = vsel %vm234_vm1, %v891_v17, 0 }
 0x679   :  { %1723 = vmatpush3.bf16.msra.mxu0 %v896_v18 }
 0x67a   :  { %v1847_v19 = vpop.eup %1846  ;;  %1734 = vmatprep.subr.bf16.mxu0 %v2086_v0 }
 0x67b   :  { %v885_v21 = vmul.f32 %v1847_v19, %v1843_v11  ;;  %v988_v29 = vpop.permute.xlu0 %987 }
 0x67d   :  { %v887_v22 = vpack.c.bf16 %v885_v21, %v885_v21 }
 0x67e   :  { %v1849_v23 = vpop.eup %1848 }
 0x67f   :  { %v886_v24 = vmul.f32 %v1849_v23, %v1845_v13  ;;  %1725 = vmatmul.mubr.msk.bf16.vlgmr.msra.gmra.mrb[24].mxu0 %vm230_vm2, %v887_v22 }
 0x680   :  { %1736 = vmatprep.mubr.msk.bf16.mxu0 %vm2087_vm0, %v2086_v0 }
 0x681   :  { %v888_v27 = vpack.c.bf16 %v886_v24, %v886_v24 }
 0x682   :  { %1735 = vmatpush3.bf16.xpose.msra.mxu0 %v995_v26 }
 0x683   :  { %1731 = vmatmul.mubr.msk.bf16.vlgmr.msra.gmra.mrb[28].mxu1 %vm230_vm2, %v888_v27  ;;  %1746 = vmatprep.subr.bf16.mxu0 %v2086_v0 }
 0x684   :  { %1741 = vmatpush3.bf16.xpose.msra.mxu1 %v1045_v28  ;;  %1742 = vmatprep.mubr.msk.bf16.mxu1 %vm2087_vm0, %v2086_v0 }
 0x685   :  { %1752 = vmatprep.subr.bf16.mxu1 %v2086_v0 }
 0x689   :  { %1737 = vmatmul.mubr.msk.bf16.vlgmr.msra.gmra.mrb[28].mxu0 %vm230_vm2, %v988_v29 }
 0x68a   :  { %1748 = vmatprep.mubr.msk.bf16.mxu0 %vm2087_vm0, %v2086_v0 }
 0x68b   :  { %1743 = vmatmul.mubr.msk.bf16.vlgmr.msra.gmra.mrb[32].mxu1 %vm230_vm2, %v1038_v30 }
 0x68c   :  { %1754 = vmatprep.mubr.msk.bf16.mxu1 %vm2087_vm0, %v2086_v0 }
 0x752   :  { %v2458_v31 = vpop.f32.mrb[24].mxu0 }
 0x753   :  { %v1726_v32 = vpop.f32.mrb[25].mxu0 }
 0x754   :  { %v935_v33 = vpop.f32.mrb[26].mxu0 }
 0x755   :  { %v1727_v34 = vpop.f32.mrb[27].mxu0 }
 0x756   :  { %v2460_v35 = vpop.f32.mrb[28].mxu1 }
 0x757   :  { %v1810_v36 = vpack.i.bf16 %v2460_v35, %v2458_v31  ;;  %v1732_v37 = vpop.f32.mrb[29].mxu1 }
 0x758   :  { %v984_v38 = vpop.f32.mrb[30].mxu1 }
 0x759   :  { %v1733_v40 = vpop.f32.mrb[31].mxu1 }
 0x75c   :  { %v1031_v41 = vpop.f32.mrb[28].mxu0 }
 0x75d   :  { %v1032_v42 = vadd.f32 %v2386_v2, %v1031_v41  ;;  %v1738_v45 = vpop.f32.mrb[29].mxu0 }
 0x75e   :  { %v1034_v46 = vpop.f32.mrb[30].mxu0  ;;  %v1081_v48 = vpop.f32.mrb[32].mxu1 }
 0x75f   :  { %v1082_v49 = vadd.f32 %v2386_v2, %v1081_v48  ;;  %v1739_v50 = vpop.f32.mrb[31].mxu0  ;;  %v1744_v51 = vpop.f32.mrb[33].mxu1  ;;  %v1087_v54 = vsel %vm230_vm2, %v1032_v42, -inf }
 0x760   :  { %v1084_v55 = vpop.f32.mrb[34].mxu1  ;;  %1088 = vmax.xlane.f32.xlu0 %v1087_v54 }
 0x761   :  { %v1745_v56 = vpop.f32.mrb[35].mxu1  ;;  %v1090_v57 = vsel %vm230_vm2, %v1082_v49, -inf }
 0x762   :  { %1091 = vmax.xlane.f32.xlu1 %v1090_v57 }
 0x773   :  { %1159 = vrot.lane.b32.xlu1 %v2375_v62, %s2089_s10 }
 0x777   :  { %1209 = vrot.lane.b32.xlu1 %v2346_v43, %s2090_s0 }
 0x77b   :  { %1259 = vrot.lane.b32.xlu1 %v2351_v47, %s2090_s0 }
 0x77f   :  { %1257 = vrot.lane.b32.xlu1 %v2363_v53, %s2090_s0 }
 0x7ed   :  { %v1089_v58 = vpop.xlane.xlu0 %1088 }
 0x7ee   :  { %v1093_v60 = vsub.f32 %v1032_v42, %v1089_v58 }
 0x7ef   :  { %v1092_v61 = vpop.xlane.xlu1 %1091 }
 0x7f0   :  { %v1095_v63 = vmul.f32 1.442695, %v1093_v60  ;;  %v1094_v1 = vsub.f32 %v1082_v49, %v1092_v61 }
 0x7f2   :  { %1850 = vpow2.f32 %v1095_v63  ;;  %v1097_v3 = vmul.f32 1.442695, %v1094_v1 }
 0x7f3   :  { %v1160_v4 = vpop.permute.xlu1 %1159 }
 0x7f4   :  { %1852 = vpow2.f32 %v1097_v3  ;;  %v1165_v5 = vsel %vm234_vm1, %v1160_v4, 0 }
 0x7f5   :  { %1753 = vmatpush3.bf16.msra.mxu1 %v1165_v5 }
 0x7f6   :  { %1764 = vmatprep.subr.bf16.mxu1 %v2086_v0 }
 0x7f7   :  { %v1210_v12 = vpop.permute.xlu1 %1209 }
 0x7fb   :  { %v1260_v17 = vpop.permute.xlu1 %1259 }
 0x7fc   :  { %v1851_v43 = vpop.eup %1850  ;;  %v1265_v19 = vsel %vm230_vm2, %v1260_v17, 0 }
 0x7fd   :  { %v1099_v47 = vsel %vm230_vm2, %v1851_v43, 0.0 }
 0x7fe   :  { %v1853_v6 = vpop.eup %1852  ;;  %1100 = vadd.xlane.f32.xlu0 %v1099_v47 }
 0x7ff   :  { %v1102_v53 = vsel %vm230_vm2, %v1853_v6, 0.0  ;;  %v1258_v21 = vpop.permute.xlu1 %1257 }
 0x802   :  { %1103 = vadd.xlane.f32.xlu0 %v1102_v53  ;;  %v1833_v53 = vld [vmem:[%s2564_s11 + $0x8] sm:$0xff]  }
 0x818   :  { %1111 = vrot.lane.b32.xlu0 %v2373_v59, %s2089_s10 }
 0x81c   :  { %1207 = vrot.lane.b32.xlu0 %v2361_v52, %s2090_s0  ;;  %v1215_v52 = vsel %vm230_vm2, %v1210_v12, 0 }
 0x88b   :  { %v1101_v7 = vpop.xlane.xlu0 %1100 }
 0x88c   :  { %1854 = vrcp.f32 %v1101_v7 }
 0x88f   :  { %v1104_v8 = vpop.xlane.xlu0 %1103 }
 0x890   :  { %1856 = vrcp.f32 %v1104_v8 }
 0x893   :  { %v1112_v9 = vpop.permute.xlu0 %1111 }
 0x894   :  { %v1117_v10 = vsel %vm234_vm1, %v1112_v9, 0 }
 0x895   :  { %1747 = vmatpush3.bf16.msra.mxu0 %v1117_v10 }
 0x896   :  { %v1855_v11 = vpop.eup %1854  ;;  %1758 = vmatprep.subr.bf16.mxu0 %v2086_v0 }
 0x897   :  { %v1107_v13 = vmul.f32 %v1855_v11, %v1851_v43  ;;  %v1208_v20 = vpop.permute.xlu0 %1207 }
 0x899   :  { %v1109_v14 = vpack.c.bf16 %v1107_v13, %v1107_v13 }
 0x89a   :  { %v1857_v15 = vpop.eup %1856 }
 0x89b   :  { %v1108_v16 = vmul.f32 %v1857_v15, %v1853_v6  ;;  %1749 = vmatmul.mubr.msk.bf16.vlgmr.msra.gmra.mrb[32].mxu0 %vm230_vm2, %v1109_v14  ;;  %v1832_v6 = vld [vmem:[%s2564_s11] sm:$0xff]  }
 0x89c   :  { %1760 = vmatprep.mubr.msk.bf16.mxu0 %vm2087_vm0, %v2086_v0 }
 0x89d   :  { %v1110_v18 = vpack.c.bf16 %v1108_v16, %v1108_v16 }
 0x89e   :  { %1759 = vmatpush3.bf16.xpose.msra.mxu0 %v1215_v52 }
 0x89f   :  { %1755 = vmatmul.mubr.msk.bf16.vlgmr.msra.gmra.mrb[36].mxu1 %vm230_vm2, %v1110_v18  ;;  %1770 = vmatprep.subr.bf16.mxu0 %v2086_v0 }
 0x8a0   :  { %1765 = vmatpush3.bf16.xpose.msra.mxu1 %v1265_v19  ;;  %1766 = vmatprep.mubr.msk.bf16.mxu1 %vm2087_vm0, %v2086_v0 }
 0x8a1   :  { %1776 = vmatprep.subr.bf16.mxu1 %v2086_v0 }
 0x8a5   :  { %1761 = vmatmul.mubr.msk.bf16.vlgmr.msra.gmra.mrb[36].mxu0 %vm230_vm2, %v1208_v20 }
 0x8a6   :  { %1772 = vmatprep.mubr.msk.bf16.mxu0 %vm2087_vm0, %v2086_v0 }
 0x8a7   :  { %1767 = vmatmul.mubr.msk.bf16.vlgmr.msra.gmra.mrb[40].mxu1 %vm230_vm2, %v1258_v21 }
 0x8a8   :  { %1778 = vmatprep.mubr.msk.bf16.mxu1 %vm2087_vm0, %v2086_v0 }
 0x96e   :  { %v1153_v22 = vpop.f32.mrb[32].mxu0 }
 0x96f   :  { %v1750_v23 = vpop.f32.mrb[33].mxu0 }
 0x970   :  { %v1156_v24 = vpop.f32.mrb[34].mxu0 }
 0x971   :  { %v1751_v25 = vpop.f32.mrb[35].mxu0 }
 0x972   :  { %v1201_v26 = vpop.f32.mrb[36].mxu1 }
 0x973   :  { %v1815_v27 = vpack.i.bf16 %v1201_v26, %v1153_v22  ;;  %v1756_v28 = vpop.f32.mrb[37].mxu1 }
 0x974   :  { %v1204_v29 = vpop.f32.mrb[38].mxu1 }
 0x975   :  { %v1757_v30 = vpop.f32.mrb[39].mxu1 }
 0x976   :  { %v1582_v30 = vld [vmem:[%s2565_s12] ss:$0 sm:$0xff] }
 0x978   :  { %v1251_v32 = vpop.f32.mrb[36].mxu0 }
 0x979   :  { %v1252_v33 = vadd.f32 %v2386_v2, %v1251_v32  ;;  %v1762_v34 = vpop.f32.mrb[37].mxu0 }
 0x97a   :  { %v1254_v37 = vpop.f32.mrb[38].mxu0  ;;  %v1301_v38 = vpop.f32.mrb[40].mxu1 }
 0x97b   :  { %v1302_v40 = vadd.f32 %v2386_v2, %v1301_v38  ;;  %v1763_v41 = vpop.f32.mrb[39].mxu0  ;;  %v1768_v42 = vpop.f32.mrb[41].mxu1  ;;  %v1307_v45 = vsel %vm230_vm2, %v1252_v33, -inf }
 0x97c   :  { %v1304_v46 = vpop.f32.mrb[42].mxu1  ;;  %1308 = vmax.xlane.f32.xlu0 %v1307_v45 }
 0x97d   :  { %v1769_v48 = vpop.f32.mrb[43].mxu1  ;;  %v1310_v49 = vsel %vm230_vm2, %v1302_v40, -inf }
 0x97e   :  { %1311 = vmax.xlane.f32.xlu1 %v1310_v49 }
 0x98f   :  { %1379 = vrot.lane.b32.xlu1 %v2375_v62, %s2090_s0 }
 0x993   :  { %1811 = vrot.lane.b32.xlu1 %v1810_v36, %s2091_s22 }
 0x997   :  { %1816 = vrot.lane.b32.xlu1 %v1815_v27, %s2092_s19 }
 0xa09   :  { %v1309_v2 = vpop.xlane.xlu0 %1308 }
 0xa0a   :  { %v1313_v50 = vsub.f32 %v1252_v33, %v1309_v2 }
 0xa0b   :  { %v1312_v51 = vpop.xlane.xlu1 %1311 }
 0xa0c   :  { %v1315_v54 = vmul.f32 1.442695, %v1313_v50  ;;  %v1314_v55 = vsub.f32 %v1302_v40, %v1312_v51 }
 0xa0e   :  { %1858 = vpow2.f32 %v1315_v54  ;;  %v1317_v56 = vmul.f32 1.442695, %v1314_v55 }
 0xa0f   :  { %v1380_v57 = vpop.permute.xlu1 %1379 }
 0xa10   :  { %1860 = vpow2.f32 %v1317_v56  ;;  %v1385_v58 = vsel %vm234_vm1, %v1380_v57, 0 }
 0xa11   :  { %1777 = vmatpush3.bf16.msra.mxu1 %v1385_v58 }
 0xa13   :  { %v1812_v16 = vpop.permute.xlu1 %1811 }
 0xa14   :  { %v1814_v52 = vunpack.i.h.bf16 %v1812_v16 }
 0xa16   :  { %v1452_v21 = vsel %vm230_vm2, %v2418_v44, %v1814_v52 }
 0xa17   :  { %v1817_v17 = vpop.permute.xlu1 %1816 }
 0xa18   :  { %v1859_v62 = vpop.eup %1858  ;;  %v1819_v18 = vunpack.i.h.bf16 %v1817_v17  ;;  %v1818_v19 = vunpack.i.l.bf16 %v1817_v17 }
 0xa19   :  { %v1319_v60 = vsel %vm230_vm2, %v1859_v62, 0.0 }
 0xa1a   :  { %v1861_v61 = vpop.eup %1860  ;;  %1320 = vadd.xlane.f32.xlu0 %v1319_v60  ;;  %v1455_v25 = vsel %vm1453_vm4, %v1452_v21, %v1819_v18 }
 0xa1b   :  { %v1322_v31 = vsel %vm230_vm2, %v1861_v61, 0.0 }
 0xa1e   :  { %1323 = vadd.xlane.f32.xlu0 %v1322_v31 }
 0xa34   :  { %1331 = vrot.lane.b32.xlu0 %v2373_v59, %s2090_s0 }
 0xaa7   :  { %v1321_v35 = vpop.xlane.xlu0 %1320 }
 0xaa8   :  { %1862 = vrcp.f32 %v1321_v35 }
 0xaab   :  { %v1324_v36 = vpop.xlane.xlu0 %1323 }
 0xaac   :  { %1864 = vrcp.f32 %v1324_v36 }
 0xaaf   :  { %v1332_v63 = vpop.permute.xlu0 %1331 }
 0xab0   :  { %v1337_v1 = vsel %vm234_vm1, %v1332_v63, 0 }
 0xab1   :  { %1771 = vmatpush3.bf16.msra.mxu0 %v1337_v1 }
 0xab2   :  { %v1863_v3 = vpop.eup %1862  ;;  %1782 = vmatprep.subr.bf16.mxu0 %v2086_v0 }
 0xab3   :  { %v1327_v4 = vmul.f32 %v1863_v3, %v1859_v62 }
 0xab5   :  { %v1329_v5 = vpack.c.bf16 %v1327_v4, %v1327_v4 }
 0xab6   :  { %v1865_v43 = vpop.eup %1864 }
 0xab7   :  { %v1328_v47 = vmul.f32 %v1865_v43, %v1861_v61  ;;  %1773 = vmatmul.mubr.msk.bf16.vlgmr.msra.gmra.mrb[40].mxu0 %vm230_vm2, %v1329_v5 }
 0xab8   :  { %1786 = vmatprep.mubr.msk.bf16.mxu0 %vm2087_vm0, %v2086_v0  ;;  %1783 = vmatpush3.bf16.msra.mxu0 %v1832_v6 }
 0xab9   :  { %v1330_v59 = vpack.c.bf16 %v1328_v47, %v1328_v47  ;;  %1784 = vmatprep.subr.bf16.mxu0 %v2086_v0  ;;  %v1813_v0 = vunpack.i.l.bf16 %v1812_v16 }
 0xabb   :  { %1779 = vmatmul.mubr.msk.bf16.vlgmr.msra.gmra.mrb[44].mxu1 %vm230_vm2, %v1330_v59  ;;  %v1451_v22 = vsel %vm230_vm2, %v2416_v39, %v1813_v0 }
 0xabc   :  { %1785 = vmatpush3.bf16.msra.mxu0 %v1833_v53  ;;  %v1454_v26 = vsel %vm1453_vm4, %v1451_v22, %v1818_v19 }
 0xb8a   :  { %v1373_v7 = vpop.f32.mrb[40].mxu0 }
 0xb8b   :  { %v1774_v8 = vpop.f32.mrb[41].mxu0 }
 0xb8c   :  { %v1376_v9 = vpop.f32.mrb[42].mxu0 }
 0xb8d   :  { %v1775_v10 = vpop.f32.mrb[43].mxu0 }
 0xb8e   :  { %v1421_v11 = vpop.f32.mrb[44].mxu1 }
 0xb8f   :  { %v1820_v12 = vpack.i.bf16 %v1421_v11, %v1373_v7  ;;  %v1780_v13 = vpop.f32.mrb[45].mxu1 }
 0xb90   :  { %v1424_v14 = vpop.f32.mrb[46].mxu1 }
 0xb91   :  { %v1781_v15 = vpop.f32.mrb[47].mxu1  ;;  %1821 = vrot.lane.b32.xlu0 %v1820_v12, %s2093_s25 }
 0xc03   :  { %v1822_v20 = vpop.permute.xlu0 %1821 }
 0xc04   :  { %v1824_v23 = vunpack.i.h.bf16 %v1822_v20  ;;  %v1823_v24 = vunpack.i.l.bf16 %v1822_v20 }
 0xc06   :  { %v1458_v27 = vsel %vm1456_vm5, %v1455_v25, %v1824_v23  ;;  %v1457_v28 = vsel %vm1456_vm5, %v1454_v26, %v1823_v24 }
 0xc07   :  { %v1459_v29 = vpack.c.bf16 %v1458_v27, %v1457_v28 }
 0xc09   :  { %1787 = vmatmul.mubr.msk.bf16.vlgmr.msra.gmra.mrb[44].mxu0 %vm181_vm3, %v1459_v29 }
 0xcdc   :  { %v1520_v32 = vpop.f32.mrb[44].mxu0 }
 0xcdd   :  { %v1521_v44 = vadd.f32 %v1582_v30, %v1520_v32  ;;  %v1788_v33 = vpop.f32.mrb[45].mxu0 }
 0xcde   :  { %v1523_v34 = vpop.f32.mrb[46].mxu0 }
 0xcdf   :  { %1527 = vst.msk [vmem:[#allocation16] sm:$0xff] %vm181_vm3, %v1521_v44  ;;  %v1524_v39 = vadd.f32 %v1582_v30, %v1523_v34  ;;  %v1789_v37 = vpop.f32.mrb[47].mxu0 }
 0xce1   :  { %1528 = vst.msk [vmem:[#allocation16 + $0x8] sm:$0xff] %vm181_vm3, %v1524_v39 }
 0xce2   :  { %2053 = shalt.err (!%p2050_p12)
}
 0xce3   :  { %s2054_s2 = scalar_lea.hbm %s2566_s13, 256 }
 0xce4   :  { %p2055_p13 = scmp.ne.s32.totalorder %s2566_s13, %s2054_s2  ;;  %p2058_p0 = scmp.lt.u32.totalorder %s2054_s2, %s2566_s13 }
 0xce6   :  { %p2060_p1 = pnand %p2058_p0, %p2055_p13 }
 0xce8   :  { %2063 = shalt.err (!%p2060_p1)
}
 0xce9   :  { %s2095_s9 = smov 128  }
 0xcea   :  { %1540 = dma.vmem_to_hbm [thread:$0]  %s1535_s27, 256, %s2566_s13, [#allocation4], %s2095_s9, %s2095_s9, %s2091_s22  }
 0xceb   :  { %2074 = dma.done.wait [#allocation4], 256  }
 0xcec   :  { %2075 = vsyncadd [#allocation4], 4294967040 }
 0xced   :  { %1544 = vsyncpa [#allocation3], 1 }
 0xcee   :  { %1545 = vsyncpa [#allocation6], 1 }
 0xcef   :  { %1546 = vsyncpa [#allocation9], 1 }
 0xcf0   :  { %1547 = vsyncpa [#allocation12], 1 }
 0xcf1   :  { %1548 = vsyncpa [#allocation15], 1 }
 0xcf2   :  { %1549 = vsyncpa [#allocation4], 1 }

</bundles_post_ra>
